<compile_context>
chip_gen: v6e
topology: v6e:2x2x1
jax: 0.10.0
libtpu: 0.0.40
codegen_flags: <defaults>
</compile_context>

<pallas_src>
import jax
import jax.numpy as jnp
from jax.experimental import pallas as pl
from jax.experimental.pallas import tpu as pltpu

# ---- small config (PhiMoEConfig structure, scaled down) ----
T = 8            # tokens (flattened)
H = 64           # hidden_size
NH = 4           # num_attention_heads
NKV = 2          # num_key_value_heads
HD = 16          # head_dim
INTER = 128      # intermediate_size per expert
E = 8            # num_local_experts
TOPK = 2         # num_experts_per_tok
EPS = 1e-5       # rms_norm_eps (used as LayerNorm eps)
THETA = 10000.0  # rope_theta
JITTER = 0.01    # sparsemixer jitter_eps

Q_SIZE = NH * HD               # 64
KV_SIZE = NKV * HD             # 32
QKV = Q_SIZE + 2 * KV_SIZE     # 128 (exactly one vreg wide -> lane dense)
QPK = NH // NKV                # q heads per kv head
NEG_INF = float("-inf")


# ----------------------------- shared math ---------------------------------
def _layernorm(v, w, b):
    mean = jnp.mean(v, axis=-1, keepdims=True)
    var = jnp.mean((v - mean) ** 2, axis=-1, keepdims=True)
    return (v - mean) * jax.lax.rsqrt(var + EPS) * w + b


def _softmax_last(s, recip):
    m = jnp.max(s, axis=-1, keepdims=True)
    e = jnp.exp(s - m)
    return e * recip(jnp.sum(e, axis=-1, keepdims=True))


def _sparsemixer_combine(scores, recip):
    """Dense (T, E) combine weights for top-2 sparsemixer (no renormalize).

    NOTE: like the PyTorch reference, factor = max(|scores|, max) can be ~0 if
    all router logits are ~0 (0/0 in the mask compare).  Kept as-is to match
    the original module's semantics exactly.
    """
    f32 = jnp.float32
    iota_e = jax.lax.broadcasted_iota(jnp.int32, scores.shape, 1)

    def first_argmax_onehot(s):
        mx = jnp.max(s, axis=-1, keepdims=True)
        idx = jnp.min(jnp.where(s == mx, iota_e, E), axis=-1, keepdims=True)
        return iota_e == idx, mx

    onehot1, max1 = first_argmax_onehot(scores)
    factor1 = jnp.maximum(jnp.abs(scores), max1)
    mask1 = (max1 - scores) / factor1 > 2 * JITTER
    g1 = _softmax_last(jnp.where(mask1, NEG_INF, scores), recip)
    mult1 = jnp.sum(jnp.where(onehot1, g1, 0.0), axis=-1, keepdims=True)

    masked_scores = jnp.where(onehot1, NEG_INF, scores)
    onehot2, max2 = first_argmax_onehot(masked_scores)
    factor2 = jnp.maximum(jnp.abs(scores), max2)
    mask2 = (max2 - scores) / factor2 > 2 * JITTER
    g2 = _softmax_last(jnp.where(mask2, NEG_INF, masked_scores), recip)
    mult2 = jnp.sum(jnp.where(onehot2, g2, 0.0), axis=-1, keepdims=True)

    return mult1 * onehot1.astype(f32) + mult2 * onehot2.astype(f32)


def _expert_ffn(hn_bf16, w1_e, w2_e):
    """silu(x@Wgate) * (x@Wup) @ Wdown; bf16 MXU operands, f32 accumulation."""
    f32, bf16 = jnp.float32, jnp.bfloat16
    gu = jnp.dot(hn_bf16, w1_e, preferred_element_type=f32)   # (T, 2*INTER)
    g = gu[:, :INTER]
    u = gu[:, INTER:]
    act = g * jax.nn.sigmoid(g) * u
    return jnp.dot(act.astype(bf16), w2_e, preferred_element_type=f32)  # (T, H)


# ------------- fused kernel: attention + router + dense MoE -----------------
def phimoe_layer_kernel(x_ref, cos_ref, sin_ref, ln1w_ref, ln1b_ref,
                        ln2w_ref, ln2b_ref, wqkv_ref, wo_ref, gate_ref,
                        w1_ref, w2_ref, out_ref):
    f32, bf16 = jnp.float32, jnp.bfloat16
    scaling = HD ** -0.5
    # Exact 1/x wherever the result can change a routing decision
    # (attention -> residual -> hn -> bf16 -> gate argmax / jitter thresholds).
    recip_exact = lambda d: 1.0 / d
    # Approx recip (EUP slot) only for the decision-free router normalization.
    recip_approx = lambda d: pl.reciprocal(d, approx=True)

    x = x_ref[...]
    xn = _layernorm(x, ln1w_ref[...], ln1b_ref[...])
    qkv = jnp.dot(xn.astype(bf16), wqkv_ref[...], preferred_element_type=f32)  # (T, 128)

    # ---- vectorized neox RoPE over the full (T, 128) qkv slab ----
    # Within every 16-wide head block: out = v*cos + [-v2, v1]*sin.
    # [-v2, v1] is built from two full-width rolls + a half select; V columns
    # (>= Q_SIZE+KV_SIZE) pass through untouched.
    col = jax.lax.broadcasted_iota(jnp.int32, (T, QKV), 1)
    first_half = (col % HD) < (HD // 2)
    is_rope = col < (Q_SIZE + KV_SIZE)
    fwd = pltpu.roll(qkv, HD // 2, 1)          # fwd[c] = qkv[c - HD//2]
    bwd = pltpu.roll(qkv, QKV - HD // 2, 1)    # bwd[c] = qkv[c + HD//2]
    rot = jnp.where(first_half, -bwd, fwd)     # per-head rotate-half
    roped = jnp.where(is_rope, qkv * cos_ref[...] + rot * sin_ref[...], qkv)

    # ---- causal GQA attention: heads batched into one (NH, T, T) softmax ----
    q_b = jnp.stack([roped[:, h * HD:(h + 1) * HD] for h in range(NH)], axis=0)
    k_b = jnp.stack(
        [roped[:, Q_SIZE + (h // QPK) * HD: Q_SIZE + (h // QPK + 1) * HD]
         for h in range(NH)], axis=0)
    v_b = jnp.stack(
        [roped[:, Q_SIZE + KV_SIZE + (h // QPK) * HD:
               Q_SIZE + KV_SIZE + (h // QPK + 1) * HD]
         for h in range(NH)], axis=0)

    s = jnp.einsum("htd,hsd->hts", q_b.astype(bf16), k_b.astype(bf16),
                   preferred_element_type=f32) * scaling          # (NH, T, T)
    row3 = jax.lax.broadcasted_iota(jnp.int32, (NH, T, T), 1)
    col3 = jax.lax.broadcasted_iota(jnp.int32, (NH, T, T), 2)
    s = jnp.where(row3 >= col3, s, NEG_INF)
    p = _softmax_last(s, recip_exact)
    attn_b = jnp.einsum("hts,hsd->htd", p.astype(bf16), v_b.astype(bf16),
                        preferred_element_type=f32)               # (NH, T, HD)
    attn = jnp.concatenate([attn_b[h] for h in range(NH)], axis=-1)  # (T, NH*HD)
    o = jnp.dot(attn.astype(bf16), wo_ref[...], preferred_element_type=f32)

    residual = x + o
    hn = _layernorm(residual, ln2w_ref[...], ln2b_ref[...])
    hn_b = hn.astype(bf16)

    # ---- router: sparsemixer top-2 dense combine weights ----
    scores = jnp.dot(hn_b, gate_ref[...], preferred_element_type=f32)  # (T, E)
    comb = _sparsemixer_combine(scores, recip_approx)

    # ---- dense MoE over all experts, fused into two MXU matmuls ----
    # w1_ref: (H, E*2*INTER) = all experts' [gate||up] concatenated along N.
    gu = jnp.dot(hn_b, w1_ref[...], preferred_element_type=f32)   # (T, E*2*INTER)
    acts = []
    for e in range(E):
        g = gu[:, e * 2 * INTER: e * 2 * INTER + INTER]
        u = gu[:, e * 2 * INTER + INTER: (e + 1) * 2 * INTER]
        # Bake the per-token combine weight into the activation so the down
        # projection of ALL experts collapses into a single matmul.
        acts.append(g * jax.nn.sigmoid(g) * u * comb[:, e:e + 1])
    act = jnp.concatenate(acts, axis=-1).astype(bf16)             # (T, E*INTER)
    # w2_ref: (E*INTER, H) = all experts' down projections stacked along K.
    moe = jnp.dot(act, w2_ref[...], preferred_element_type=f32)   # (T, H)

    out = moe + residual
    # single lane-dense (T, 2H) = (8, 128) store: [final_hidden || residual]
    out_ref[...] = jnp.concatenate([out, residual], axis=-1)


# ------------------------------- wrapper ------------------------------------
def phimoe_decoder_layer(positions, x, params):
    # rotary tables (glue): base (T, HD//2) plus a period-(HD//2) tile to QKV width
    inv_freq = 1.0 / (THETA ** (jnp.arange(0, HD, 2, dtype=jnp.float32) / HD))
    freqs = positions.astype(jnp.float32)[:, None] * inv_freq[None, :]
    cos_b, sin_b = jnp.cos(freqs), jnp.sin(freqs)
    reps = QKV // (HD // 2)
    cos_t = jnp.tile(cos_b, (1, reps))
    sin_t = jnp.tile(sin_b, (1, reps))

    vmem = pl.BlockSpec(memory_space=pltpu.MemorySpace.VMEM)
    args = (x, cos_t, sin_t,
            params["ln1_w"], params["ln1_b"], params["ln2_w"], params["ln2_b"],
            params["wqkv"], params["wo"], params["gate"],
            params["w1"], params["w2"])
    out_res = pl.pallas_call(
        phimoe_layer_kernel,
        out_shape=jax.ShapeDtypeStruct((T, 2 * H), jnp.float32),
        in_specs=[vmem] * len(args),
        out_specs=vmem,
    )(*args)

    out = out_res[:, :H]
    residual = out_res[:, H:]
    return out, residual, cos_b, sin_b


# --------------------------- pure-JAX reference -----------------------------
def reference_layer(x, cos_b, sin_b, params):
    f32, bf16 = jnp.float32, jnp.bfloat16
    recip = lambda d: 1.0 / d
    scaling = HD ** -0.5

    xn = _layernorm(x, params["ln1_w"], params["ln1_b"])
    qkv = jnp.dot(xn.astype(bf16), params["wqkv"], preferred_element_type=f32)

    def rope(v):  # ground-truth neox rotate-half on one (T, HD) head
        v1, v2 = v[:, :HD // 2], v[:, HD // 2:]
        return jnp.concatenate([v1 * cos_b - v2 * sin_b, v2 * cos_b + v1 * sin_b], -1)

    row = jax.lax.broadcasted_iota(jnp.int32, (T, T), 0)
    col = jax.lax.broadcasted_iota(jnp.int32, (T, T), 1)
    causal = row >= col

    attn_heads = []
    for h in range(NH):
        kvh = h // QPK
        qh = rope(qkv[:, h * HD:(h + 1) * HD])
        kh = rope(qkv[:, Q_SIZE + kvh * HD: Q_SIZE + (kvh + 1) * HD])
        vh = qkv[:, Q_SIZE + KV_SIZE + kvh * HD: Q_SIZE + KV_SIZE + (kvh + 1) * HD]
        s = jax.lax.dot_general(qh.astype(bf16), kh.astype(bf16),
                                (((1,), (1,)), ((), ())),
                                preferred_element_type=f32) * scaling
        s = jnp.where(causal, s, NEG_INF)
        p = _softmax_last(s, recip)
        attn_heads.append(jnp.dot(p.astype(bf16), vh.astype(bf16),
                                  preferred_element_type=f32))
    attn = jnp.concatenate(attn_heads, -1)
    o = jnp.dot(attn.astype(bf16), params["wo"], preferred_element_type=f32)

    residual = x + o
    hn = _layernorm(residual, params["ln2_w"], params["ln2_b"])
    hn_b = hn.astype(bf16)
    scores = jnp.dot(hn_b, params["gate"], preferred_element_type=f32)
    comb = _sparsemixer_combine(scores, recip)

    moe = jnp.zeros((T, H), f32)
    for e in range(E):
        w1_e = params["w1"][:, e * 2 * INTER:(e + 1) * 2 * INTER]
        w2_e = params["w2"][e * INTER:(e + 1) * INTER, :]
        moe = moe + comb[:, e:e + 1] * _expert_ffn(hn_b, w1_e, w2_e)
    return moe + residual, residual


def make_params(key):
    ks = jax.random.split(key, 9)
    s = 0.05
    bf16 = jnp.bfloat16
    return {
        "ln1_w": 1.0 + 0.1 * jax.random.normal(ks[0], (1, H), jnp.float32),
        "ln1_b": 0.1 * jax.random.normal(ks[1], (1, H), jnp.float32),
        "ln2_w": 1.0 + 0.1 * jax.random.normal(ks[2], (1, H), jnp.float32),
        "ln2_b": 0.1 * jax.random.normal(ks[3], (1, H), jnp.float32),
        # matmul weights stored in bf16, (in, out) layout; dots accumulate f32.
        "wqkv": (s * jax.random.normal(ks[4], (H, QKV), jnp.float32)).astype(bf16),
        "wo": (s * jax.random.normal(ks[5], (Q_SIZE, H), jnp.float32)).astype(bf16),
        "gate": (s * jax.random.normal(ks[6], (H, E), jnp.float32)).astype(bf16),
        # experts pre-flattened for the fused kernel:
        #   w1: (H, E*2*INTER)  all experts' [gate||up] along N
        #   w2: (E*INTER, H)    all experts' down projections stacked along K
        "w1": (s * jax.random.normal(ks[7], (H, E * 2 * INTER), jnp.float32)).astype(bf16),
        "w2": (s * jax.random.normal(ks[8], (E * INTER, H), jnp.float32)).astype(bf16),
    }


if __name__ == "__main__":
    key = jax.random.PRNGKey(0)
    kp, kx = jax.random.split(key)
    params = make_params(kp)
    x = jax.random.normal(kx, (T, H), jnp.float32)
    positions = jnp.arange(T, dtype=jnp.int32)

    out, res, cos_b, sin_b = phimoe_decoder_layer(positions, x, params)
    out = jax.block_until_ready(out)
    res = jax.block_until_ready(res)

    ref_out, ref_res = reference_layer(x, cos_b, sin_b, params)
    assert jnp.allclose(out, ref_out, rtol=2e-3, atol=2e-3), "hidden mismatch"
    assert jnp.allclose(res, ref_res, rtol=2e-3, atol=2e-3), "residual mismatch"

    print("KERNEL_OK")
</pallas_src>

<mosaic_0001>
module attributes {stable_mosaic.version = 11 : i64} {
  func.func @phimoe_layer_kernel(%arg0: memref<8x64xf32, #tpu.memory_space<vmem>>, %arg1: memref<8x128xf32, #tpu.memory_space<vmem>>, %arg2: memref<8x128xf32, #tpu.memory_space<vmem>>, %arg3: memref<1x64xf32, #tpu.memory_space<vmem>>, %arg4: memref<1x64xf32, #tpu.memory_space<vmem>>, %arg5: memref<1x64xf32, #tpu.memory_space<vmem>>, %arg6: memref<1x64xf32, #tpu.memory_space<vmem>>, %arg7: memref<64x128xbf16, #tpu.memory_space<vmem>>, %arg8: memref<64x64xbf16, #tpu.memory_space<vmem>>, %arg9: memref<64x8xbf16, #tpu.memory_space<vmem>>, %arg10: memref<64x2048xbf16, #tpu.memory_space<vmem>>, %arg11: memref<1024x64xbf16, #tpu.memory_space<vmem>>, %arg12: memref<8x128xf32, #tpu.memory_space<vmem>>) attributes {dimension_semantics = [], scalar_prefetch = 0 : i64, scratch_operands = 0 : i64, tpu.core_type = #tpu.core_type<tc>} {
    %c0 = arith.constant 0 : index
    %c0_0 = arith.constant 0 : index
    %0 = vector.load %arg0[%c0, %c0_0] : memref<8x64xf32, #tpu.memory_space<vmem>>, vector<8x64xf32>
    %c0_1 = arith.constant 0 : index
    %c0_2 = arith.constant 0 : index
    %1 = vector.load %arg3[%c0_1, %c0_2] : memref<1x64xf32, #tpu.memory_space<vmem>>, vector<1x64xf32>
    %c0_3 = arith.constant 0 : index
    %c0_4 = arith.constant 0 : index
    %2 = vector.load %arg4[%c0_3, %c0_4] : memref<1x64xf32, #tpu.memory_space<vmem>>, vector<1x64xf32>
    %cst = arith.constant dense<0.000000e+00> : vector<8xf32>
    %3 = vector.multi_reduction <add>, %0, %cst [1] : vector<8x64xf32> to vector<8xf32>
    %4 = vector.shape_cast %3 : vector<8xf32> to vector<8x1xf32>
    %cst_5 = arith.constant 6.400000e+01 : f32
    %5 = vector.broadcast %cst_5 : f32 to vector<8x1xf32>
    %6 = arith.divf %4, %5 : vector<8x1xf32>
    %7 = vector.broadcast %6 : vector<8x1xf32> to vector<8x64xf32>
    %8 = arith.subf %0, %7 : vector<8x64xf32>
    %9 = arith.mulf %8, %8 : vector<8x64xf32>
    %cst_6 = arith.constant dense<0.000000e+00> : vector<8xf32>
    %10 = vector.multi_reduction <add>, %9, %cst_6 [1] : vector<8x64xf32> to vector<8xf32>
    %11 = vector.shape_cast %10 : vector<8xf32> to vector<8x1xf32>
    %cst_7 = arith.constant 6.400000e+01 : f32
    %12 = vector.broadcast %cst_7 : f32 to vector<8x1xf32>
    %13 = arith.divf %11, %12 : vector<8x1xf32>
    %14 = vector.broadcast %6 : vector<8x1xf32> to vector<8x64xf32>
    %15 = arith.subf %0, %14 : vector<8x64xf32>
    %cst_8 = arith.constant 9.99999974E-6 : f32
    %16 = vector.broadcast %cst_8 : f32 to vector<8x1xf32>
    %17 = arith.addf %13, %16 : vector<8x1xf32>
    %18 = math.rsqrt %17 : vector<8x1xf32>
    %19 = vector.broadcast %18 : vector<8x1xf32> to vector<8x64xf32>
    %20 = arith.mulf %15, %19 : vector<8x64xf32>
    %21 = vector.broadcast %1 : vector<1x64xf32> to vector<8x64xf32>
    %22 = arith.mulf %20, %21 : vector<8x64xf32>
    %23 = vector.broadcast %2 : vector<1x64xf32> to vector<8x64xf32>
    %24 = arith.addf %22, %23 : vector<8x64xf32>
    %25 = arith.truncf %24 : vector<8x64xf32> to vector<8x64xbf16>
    %c0_9 = arith.constant 0 : index
    %c0_10 = arith.constant 0 : index
    %26 = vector.load %arg7[%c0_9, %c0_10] : memref<64x128xbf16, #tpu.memory_space<vmem>>, vector<64x128xbf16>
    %cst_11 = arith.constant dense<0.000000e+00> : vector<8x128xf32>
    %27 = tpu.matmul %25, %26, %cst_11 {dimension_numbers = #tpu.dot_dimension_numbers<[1], [0], [0], [1], [0, 0, 1, 1], [], []>} : vector<8x64xbf16>, vector<64x128xbf16>, vector<8x128xf32> -> vector<8x128xf32>
    %28 = tpu.iota {dimensions = array<i32: 1>} : vector<8x128xi32>
    %c16_i32 = arith.constant 16 : i32
    %c0_i32 = arith.constant 0 : i32
    %29 = arith.cmpi eq, %c16_i32, %c0_i32 : i32
    %c1_i32 = arith.constant 1 : i32
    %30 = arith.select %29, %c1_i32, %c16_i32 : i32
    %31 = vector.broadcast %30 : i32 to vector<8x128xi32>
    %32 = arith.remsi %28, %31 : vector<8x128xi32>
    %c0_i32_12 = arith.constant 0 : i32
    %33 = vector.broadcast %c0_i32_12 : i32 to vector<8x128xi32>
    %34 = arith.cmpi ne, %32, %33 : vector<8x128xi32>
    %c0_i32_13 = arith.constant 0 : i32
    %35 = vector.broadcast %c0_i32_13 : i32 to vector<8x128xi32>
    %36 = arith.cmpi slt, %32, %35 : vector<8x128xi32>
    %c0_i32_14 = arith.constant 0 : i32
    %37 = arith.cmpi slt, %30, %c0_i32_14 : i32
    %38 = vector.broadcast %37 : i1 to vector<8x128xi1>
    %39 = vector.broadcast %38 : vector<8x128xi1> to vector<8x128xi1>
    %40 = arith.xori %36, %39 : vector<8x128xi1>
    %41 = arith.andi %40, %34 : vector<8x128xi1>
    %42 = vector.broadcast %30 : i32 to vector<8x128xi32>
    %43 = arith.addi %32, %42 : vector<8x128xi32>
    %44 = arith.select %41, %43, %32 : vector<8x128xi1>, vector<8x128xi32>
    %c8_i32 = arith.constant 8 : i32
    %45 = vector.broadcast %c8_i32 : i32 to vector<8x128xi32>
    %46 = arith.cmpi slt, %44, %45 : vector<8x128xi32>
    %c96_i32 = arith.constant 96 : i32
    %47 = vector.broadcast %c96_i32 : i32 to vector<8x128xi32>
    %48 = arith.cmpi slt, %28, %47 : vector<8x128xi32>
    %c8_i32_15 = arith.constant 8 : i32
    %49 = tpu.dynamic_rotate %27 by %c8_i32_15 dim 1 : vector<8x128xf32>, i32 -> vector<8x128xf32>
    %c120_i32 = arith.constant 120 : i32
    %50 = tpu.dynamic_rotate %27 by %c120_i32 dim 1 : vector<8x128xf32>, i32 -> vector<8x128xf32>
    %cst_16 = arith.constant 0.000000e+00 : f32
    %51 = vector.broadcast %cst_16 : f32 to vector<8x128xf32>
    %52 = arith.subf %51, %50 : vector<8x128xf32>
    %53 = arith.select %46, %52, %49 : vector<8x128xi1>, vector<8x128xf32>
    %c0_17 = arith.constant 0 : index
    %c0_18 = arith.constant 0 : index
    %54 = vector.load %arg1[%c0_17, %c0_18] : memref<8x128xf32, #tpu.memory_space<vmem>>, vector<8x128xf32>
    %55 = arith.mulf %27, %54 : vector<8x128xf32>
    %c0_19 = arith.constant 0 : index
    %c0_20 = arith.constant 0 : index
    %56 = vector.load %arg2[%c0_19, %c0_20] : memref<8x128xf32, #tpu.memory_space<vmem>>, vector<8x128xf32>
    %57 = arith.mulf %53, %56 : vector<8x128xf32>
    %58 = arith.addf %55, %57 : vector<8x128xf32>
    %59 = arith.select %48, %58, %27 : vector<8x128xi1>, vector<8x128xf32>
    %60 = vector.extract_strided_slice %59 {offsets = [0, 0], sizes = [8, 16], strides = [1, 1]} : vector<8x128xf32> to vector<8x16xf32>
    %61 = vector.extract_strided_slice %59 {offsets = [0, 16], sizes = [8, 16], strides = [1, 1]} : vector<8x128xf32> to vector<8x16xf32>
    %62 = vector.extract_strided_slice %59 {offsets = [0, 32], sizes = [8, 16], strides = [1, 1]} : vector<8x128xf32> to vector<8x16xf32>
    %63 = vector.extract_strided_slice %59 {offsets = [0, 48], sizes = [8, 16], strides = [1, 1]} : vector<8x128xf32> to vector<8x16xf32>
    %64 = vector.shape_cast %60 : vector<8x16xf32> to vector<1x8x16xf32>
    %65 = vector.shape_cast %61 : vector<8x16xf32> to vector<1x8x16xf32>
    %66 = vector.shape_cast %62 : vector<8x16xf32> to vector<1x8x16xf32>
    %67 = vector.shape_cast %63 : vector<8x16xf32> to vector<1x8x16xf32>
    %68 = tpu.concatenate %64, %65, %66, %67 in 0 : vector<1x8x16xf32>, vector<1x8x16xf32>, vector<1x8x16xf32>, vector<1x8x16xf32> -> vector<4x8x16xf32>
    %69 = vector.extract_strided_slice %59 {offsets = [0, 64], sizes = [8, 16], strides = [1, 1]} : vector<8x128xf32> to vector<8x16xf32>
    %70 = vector.extract_strided_slice %59 {offsets = [0, 64], sizes = [8, 16], strides = [1, 1]} : vector<8x128xf32> to vector<8x16xf32>
    %71 = vector.extract_strided_slice %59 {offsets = [0, 80], sizes = [8, 16], strides = [1, 1]} : vector<8x128xf32> to vector<8x16xf32>
    %72 = vector.extract_strided_slice %59 {offsets = [0, 80], sizes = [8, 16], strides = [1, 1]} : vector<8x128xf32> to vector<8x16xf32>
    %73 = vector.shape_cast %69 : vector<8x16xf32> to vector<1x8x16xf32>
    %74 = vector.shape_cast %70 : vector<8x16xf32> to vector<1x8x16xf32>
    %75 = vector.shape_cast %71 : vector<8x16xf32> to vector<1x8x16xf32>
    %76 = vector.shape_cast %72 : vector<8x16xf32> to vector<1x8x16xf32>
    %77 = tpu.concatenate %73, %74, %75, %76 in 0 : vector<1x8x16xf32>, vector<1x8x16xf32>, vector<1x8x16xf32>, vector<1x8x16xf32> -> vector<4x8x16xf32>
    %78 = vector.extract_strided_slice %59 {offsets = [0, 96], sizes = [8, 16], strides = [1, 1]} : vector<8x128xf32> to vector<8x16xf32>
    %79 = vector.extract_strided_slice %59 {offsets = [0, 96], sizes = [8, 16], strides = [1, 1]} : vector<8x128xf32> to vector<8x16xf32>
    %80 = vector.extract_strided_slice %59 {offsets = [0, 112], sizes = [8, 16], strides = [1, 1]} : vector<8x128xf32> to vector<8x16xf32>
    %81 = vector.extract_strided_slice %59 {offsets = [0, 112], sizes = [8, 16], strides = [1, 1]} : vector<8x128xf32> to vector<8x16xf32>
    %82 = vector.shape_cast %78 : vector<8x16xf32> to vector<1x8x16xf32>
    %83 = vector.shape_cast %79 : vector<8x16xf32> to vector<1x8x16xf32>
    %84 = vector.shape_cast %80 : vector<8x16xf32> to vector<1x8x16xf32>
    %85 = vector.shape_cast %81 : vector<8x16xf32> to vector<1x8x16xf32>
    %86 = tpu.concatenate %82, %83, %84, %85 in 0 : vector<1x8x16xf32>, vector<1x8x16xf32>, vector<1x8x16xf32>, vector<1x8x16xf32> -> vector<4x8x16xf32>
    %87 = arith.truncf %68 : vector<4x8x16xf32> to vector<4x8x16xbf16>
    %88 = arith.truncf %77 : vector<4x8x16xf32> to vector<4x8x16xbf16>
    "tpu.trace_start"() <{level = 10 : i32, message = "htd,hsd->hts"}> : () -> ()
    %cst_21 = arith.constant dense<0.000000e+00> : vector<4x8x8xf32>
    %89 = tpu.matmul %87, %88, %cst_21 {dimension_numbers = #tpu.dot_dimension_numbers<[2], [2], [1], [1], [0, 0, 0, 1, 1, 1], [0], [0]>} : vector<4x8x16xbf16>, vector<4x8x16xbf16>, vector<4x8x8xf32> -> vector<4x8x8xf32>
    "tpu.trace_stop"() : () -> ()
    %cst_22 = arith.constant 2.500000e-01 : f32
    %90 = vector.broadcast %cst_22 : f32 to vector<4x8x8xf32>
    %91 = arith.mulf %89, %90 : vector<4x8x8xf32>
    %92 = tpu.iota {dimensions = array<i32: 1>} : vector<4x8x8xi32>
    %93 = tpu.iota {dimensions = array<i32: 2>} : vector<4x8x8xi32>
    %94 = arith.cmpi sge, %92, %93 : vector<4x8x8xi32>
    %cst_23 = arith.constant 0xFF800000 : f32
    %95 = vector.broadcast %cst_23 : f32 to vector<4x8x8xf32>
    %96 = arith.select %94, %91, %95 : vector<4x8x8xi1>, vector<4x8x8xf32>
    %cst_24 = arith.constant dense<0xFF800000> : vector<4x8xf32>
    %97 = vector.multi_reduction <maximumf>, %96, %cst_24 [2] : vector<4x8x8xf32> to vector<4x8xf32>
    %98 = vector.shape_cast %97 : vector<4x8xf32> to vector<4x8x1xf32>
    %99 = vector.broadcast %98 : vector<4x8x1xf32> to vector<4x8x8xf32>
    %100 = arith.subf %96, %99 : vector<4x8x8xf32>
    %101 = math.exp %100 : vector<4x8x8xf32>
    %cst_25 = arith.constant dense<0.000000e+00> : vector<4x8xf32>
    %102 = vector.multi_reduction <add>, %101, %cst_25 [2] : vector<4x8x8xf32> to vector<4x8xf32>
    %103 = vector.shape_cast %102 : vector<4x8xf32> to vector<4x8x1xf32>
    %cst_26 = arith.constant 1.000000e+00 : f32
    %104 = vector.broadcast %cst_26 : f32 to vector<4x8x1xf32>
    %105 = arith.divf %104, %103 : vector<4x8x1xf32>
    %106 = vector.broadcast %105 : vector<4x8x1xf32> to vector<4x8x8xf32>
    %107 = arith.mulf %101, %106 : vector<4x8x8xf32>
    %108 = arith.truncf %107 : vector<4x8x8xf32> to vector<4x8x8xbf16>
    %109 = arith.truncf %86 : vector<4x8x16xf32> to vector<4x8x16xbf16>
    "tpu.trace_start"() <{level = 10 : i32, message = "hts,hsd->htd"}> : () -> ()
    %cst_27 = arith.constant dense<0.000000e+00> : vector<4x8x16xf32>
    %110 = tpu.matmul %108, %109, %cst_27 {dimension_numbers = #tpu.dot_dimension_numbers<[2], [1], [1], [2], [0, 0, 0, 1, 1, 2], [0], [0]>} : vector<4x8x8xbf16>, vector<4x8x16xbf16>, vector<4x8x16xf32> -> vector<4x8x16xf32>
    "tpu.trace_stop"() : () -> ()
    %111 = vector.extract_strided_slice %110 {offsets = [0, 0, 0], sizes = [1, 8, 16], strides = [1, 1, 1]} : vector<4x8x16xf32> to vector<1x8x16xf32>
    %112 = vector.shape_cast %111 : vector<1x8x16xf32> to vector<8x16xf32>
    %113 = vector.extract_strided_slice %110 {offsets = [1, 0, 0], sizes = [1, 8, 16], strides = [1, 1, 1]} : vector<4x8x16xf32> to vector<1x8x16xf32>
    %114 = vector.shape_cast %113 : vector<1x8x16xf32> to vector<8x16xf32>
    %115 = vector.extract_strided_slice %110 {offsets = [2, 0, 0], sizes = [1, 8, 16], strides = [1, 1, 1]} : vector<4x8x16xf32> to vector<1x8x16xf32>
    %116 = vector.shape_cast %115 : vector<1x8x16xf32> to vector<8x16xf32>
    %117 = vector.extract_strided_slice %110 {offsets = [3, 0, 0], sizes = [1, 8, 16], strides = [1, 1, 1]} : vector<4x8x16xf32> to vector<1x8x16xf32>
    %118 = vector.shape_cast %117 : vector<1x8x16xf32> to vector<8x16xf32>
    %119 = tpu.concatenate %112, %114, %116, %118 in 1 : vector<8x16xf32>, vector<8x16xf32>, vector<8x16xf32>, vector<8x16xf32> -> vector<8x64xf32>
    %120 = arith.truncf %119 : vector<8x64xf32> to vector<8x64xbf16>
    %c0_28 = arith.constant 0 : index
    %c0_29 = arith.constant 0 : index
    %121 = vector.load %arg8[%c0_28, %c0_29] : memref<64x64xbf16, #tpu.memory_space<vmem>>, vector<64x64xbf16>
    %cst_30 = arith.constant dense<0.000000e+00> : vector<8x64xf32>
    %122 = tpu.matmul %120, %121, %cst_30 {dimension_numbers = #tpu.dot_dimension_numbers<[1], [0], [0], [1], [0, 0, 1, 1], [], []>} : vector<8x64xbf16>, vector<64x64xbf16>, vector<8x64xf32> -> vector<8x64xf32>
    %123 = arith.addf %0, %122 : vector<8x64xf32>
    %c0_31 = arith.constant 0 : index
    %c0_32 = arith.constant 0 : index
    %124 = vector.load %arg5[%c0_31, %c0_32] : memref<1x64xf32, #tpu.memory_space<vmem>>, vector<1x64xf32>
    %c0_33 = arith.constant 0 : index
    %c0_34 = arith.constant 0 : index
    %125 = vector.load %arg6[%c0_33, %c0_34] : memref<1x64xf32, #tpu.memory_space<vmem>>, vector<1x64xf32>
    %cst_35 = arith.constant dense<0.000000e+00> : vector<8xf32>
    %126 = vector.multi_reduction <add>, %123, %cst_35 [1] : vector<8x64xf32> to vector<8xf32>
    %127 = vector.shape_cast %126 : vector<8xf32> to vector<8x1xf32>
    %cst_36 = arith.constant 6.400000e+01 : f32
    %128 = vector.broadcast %cst_36 : f32 to vector<8x1xf32>
    %129 = arith.divf %127, %128 : vector<8x1xf32>
    %130 = vector.broadcast %129 : vector<8x1xf32> to vector<8x64xf32>
    %131 = arith.subf %123, %130 : vector<8x64xf32>
    %132 = arith.mulf %131, %131 : vector<8x64xf32>
    %cst_37 = arith.constant dense<0.000000e+00> : vector<8xf32>
    %133 = vector.multi_reduction <add>, %132, %cst_37 [1] : vector<8x64xf32> to vector<8xf32>
    %134 = vector.shape_cast %133 : vector<8xf32> to vector<8x1xf32>
    %cst_38 = arith.constant 6.400000e+01 : f32
    %135 = vector.broadcast %cst_38 : f32 to vector<8x1xf32>
    %136 = arith.divf %134, %135 : vector<8x1xf32>
    %137 = vector.broadcast %129 : vector<8x1xf32> to vector<8x64xf32>
    %138 = arith.subf %123, %137 : vector<8x64xf32>
    %cst_39 = arith.constant 9.99999974E-6 : f32
    %139 = vector.broadcast %cst_39 : f32 to vector<8x1xf32>
    %140 = arith.addf %136, %139 : vector<8x1xf32>
    %141 = math.rsqrt %140 : vector<8x1xf32>
    %142 = vector.broadcast %141 : vector<8x1xf32> to vector<8x64xf32>
    %143 = arith.mulf %138, %142 : vector<8x64xf32>
    %144 = vector.broadcast %124 : vector<1x64xf32> to vector<8x64xf32>
    %145 = arith.mulf %143, %144 : vector<8x64xf32>
    %146 = vector.broadcast %125 : vector<1x64xf32> to vector<8x64xf32>
    %147 = arith.addf %145, %146 : vector<8x64xf32>
    %148 = arith.truncf %147 : vector<8x64xf32> to vector<8x64xbf16>
    %c0_40 = arith.constant 0 : index
    %c0_41 = arith.constant 0 : index
    %149 = vector.load %arg9[%c0_40, %c0_41] : memref<64x8xbf16, #tpu.memory_space<vmem>>, vector<64x8xbf16>
    %cst_42 = arith.constant dense<0.000000e+00> : vector<8x8xf32>
    %150 = tpu.matmul %148, %149, %cst_42 {dimension_numbers = #tpu.dot_dimension_numbers<[1], [0], [0], [1], [0, 0, 1, 1], [], []>} : vector<8x64xbf16>, vector<64x8xbf16>, vector<8x8xf32> -> vector<8x8xf32>
    %151 = tpu.iota {dimensions = array<i32: 1>} : vector<8x8xi32>
    %cst_43 = arith.constant dense<0xFF800000> : vector<8xf32>
    %152 = vector.multi_reduction <maximumf>, %150, %cst_43 [1] : vector<8x8xf32> to vector<8xf32>
    %153 = vector.shape_cast %152 : vector<8xf32> to vector<8x1xf32>
    %154 = vector.broadcast %153 : vector<8x1xf32> to vector<8x8xf32>
    %155 = arith.cmpf oeq, %150, %154 : vector<8x8xf32>
    %c8_i32_44 = arith.constant 8 : i32
    %156 = vector.broadcast %c8_i32_44 : i32 to vector<8x8xi32>
    %157 = arith.select %155, %151, %156 : vector<8x8xi1>, vector<8x8xi32>
    %cst_45 = arith.constant dense<2147483647> : vector<8xi32>
    %158 = vector.multi_reduction <minsi>, %157, %cst_45 [1] : vector<8x8xi32> to vector<8xi32>
    %159 = vector.shape_cast %158 : vector<8xi32> to vector<8x1xi32>
    %160 = vector.broadcast %159 : vector<8x1xi32> to vector<8x8xi32>
    %161 = arith.cmpi eq, %151, %160 : vector<8x8xi32>
    %162 = math.absf %150 : vector<8x8xf32>
    %163 = vector.broadcast %153 : vector<8x1xf32> to vector<8x8xf32>
    %164 = arith.maximumf %162, %163 : vector<8x8xf32>
    %165 = vector.broadcast %153 : vector<8x1xf32> to vector<8x8xf32>
    %166 = arith.subf %165, %150 : vector<8x8xf32>
    %167 = arith.divf %166, %164 : vector<8x8xf32>
    %cst_46 = arith.constant 2.000000e-02 : f32
    %168 = vector.broadcast %cst_46 : f32 to vector<8x8xf32>
    %169 = arith.cmpf ogt, %167, %168 : vector<8x8xf32>
    %cst_47 = arith.constant 0xFF800000 : f32
    %170 = vector.broadcast %cst_47 : f32 to vector<8x8xf32>
    %171 = arith.select %169, %170, %150 : vector<8x8xi1>, vector<8x8xf32>
    %cst_48 = arith.constant dense<0xFF800000> : vector<8xf32>
    %172 = vector.multi_reduction <maximumf>, %171, %cst_48 [1] : vector<8x8xf32> to vector<8xf32>
    %173 = vector.shape_cast %172 : vector<8xf32> to vector<8x1xf32>
    %174 = vector.broadcast %173 : vector<8x1xf32> to vector<8x8xf32>
    %175 = arith.subf %171, %174 : vector<8x8xf32>
    %176 = math.exp %175 : vector<8x8xf32>
    %cst_49 = arith.constant dense<0.000000e+00> : vector<8xf32>
    %177 = vector.multi_reduction <add>, %176, %cst_49 [1] : vector<8x8xf32> to vector<8xf32>
    %178 = vector.shape_cast %177 : vector<8xf32> to vector<8x1xf32>
    %179 = tpu.reciprocal %178 {approx = true} : vector<8x1xf32> -> vector<8x1xf32>
    %180 = vector.broadcast %179 : vector<8x1xf32> to vector<8x8xf32>
    %181 = arith.mulf %176, %180 : vector<8x8xf32>
    %cst_50 = arith.constant 0.000000e+00 : f32
    %182 = vector.broadcast %cst_50 : f32 to vector<8x8xf32>
    %183 = arith.select %161, %181, %182 : vector<8x8xi1>, vector<8x8xf32>
    %cst_51 = arith.constant dense<0.000000e+00> : vector<8xf32>
    %184 = vector.multi_reduction <add>, %183, %cst_51 [1] : vector<8x8xf32> to vector<8xf32>
    %185 = vector.shape_cast %184 : vector<8xf32> to vector<8x1xf32>
    %cst_52 = arith.constant 0xFF800000 : f32
    %186 = vector.broadcast %cst_52 : f32 to vector<8x8xf32>
    %187 = arith.select %161, %186, %150 : vector<8x8xi1>, vector<8x8xf32>
    %cst_53 = arith.constant dense<0xFF800000> : vector<8xf32>
    %188 = vector.multi_reduction <maximumf>, %187, %cst_53 [1] : vector<8x8xf32> to vector<8xf32>
    %189 = vector.shape_cast %188 : vector<8xf32> to vector<8x1xf32>
    %190 = vector.broadcast %189 : vector<8x1xf32> to vector<8x8xf32>
    %191 = arith.cmpf oeq, %187, %190 : vector<8x8xf32>
    %c8_i32_54 = arith.constant 8 : i32
    %192 = vector.broadcast %c8_i32_54 : i32 to vector<8x8xi32>
    %193 = arith.select %191, %151, %192 : vector<8x8xi1>, vector<8x8xi32>
    %cst_55 = arith.constant dense<2147483647> : vector<8xi32>
    %194 = vector.multi_reduction <minsi>, %193, %cst_55 [1] : vector<8x8xi32> to vector<8xi32>
    %195 = vector.shape_cast %194 : vector<8xi32> to vector<8x1xi32>
    %196 = vector.broadcast %195 : vector<8x1xi32> to vector<8x8xi32>
    %197 = arith.cmpi eq, %151, %196 : vector<8x8xi32>
    %198 = math.absf %150 : vector<8x8xf32>
    %199 = vector.broadcast %189 : vector<8x1xf32> to vector<8x8xf32>
    %200 = arith.maximumf %198, %199 : vector<8x8xf32>
    %201 = vector.broadcast %189 : vector<8x1xf32> to vector<8x8xf32>
    %202 = arith.subf %201, %150 : vector<8x8xf32>
    %203 = arith.divf %202, %200 : vector<8x8xf32>
    %cst_56 = arith.constant 2.000000e-02 : f32
    %204 = vector.broadcast %cst_56 : f32 to vector<8x8xf32>
    %205 = arith.cmpf ogt, %203, %204 : vector<8x8xf32>
    %cst_57 = arith.constant 0xFF800000 : f32
    %206 = vector.broadcast %cst_57 : f32 to vector<8x8xf32>
    %207 = arith.select %205, %206, %187 : vector<8x8xi1>, vector<8x8xf32>
    %cst_58 = arith.constant dense<0xFF800000> : vector<8xf32>
    %208 = vector.multi_reduction <maximumf>, %207, %cst_58 [1] : vector<8x8xf32> to vector<8xf32>
    %209 = vector.shape_cast %208 : vector<8xf32> to vector<8x1xf32>
    %210 = vector.broadcast %209 : vector<8x1xf32> to vector<8x8xf32>
    %211 = arith.subf %207, %210 : vector<8x8xf32>
    %212 = math.exp %211 : vector<8x8xf32>
    %cst_59 = arith.constant dense<0.000000e+00> : vector<8xf32>
    %213 = vector.multi_reduction <add>, %212, %cst_59 [1] : vector<8x8xf32> to vector<8xf32>
    %214 = vector.shape_cast %213 : vector<8xf32> to vector<8x1xf32>
    %215 = tpu.reciprocal %214 {approx = true} : vector<8x1xf32> -> vector<8x1xf32>
    %216 = vector.broadcast %215 : vector<8x1xf32> to vector<8x8xf32>
    %217 = arith.mulf %212, %216 : vector<8x8xf32>
    %cst_60 = arith.constant 0.000000e+00 : f32
    %218 = vector.broadcast %cst_60 : f32 to vector<8x8xf32>
    %219 = arith.select %197, %217, %218 : vector<8x8xi1>, vector<8x8xf32>
    %cst_61 = arith.constant dense<0.000000e+00> : vector<8xf32>
    %220 = vector.multi_reduction <add>, %219, %cst_61 [1] : vector<8x8xf32> to vector<8xf32>
    %221 = vector.shape_cast %220 : vector<8xf32> to vector<8x1xf32>
    %222 = arith.extui %161 : vector<8x8xi1> to vector<8x8xi32>
    %223 = arith.sitofp %222 : vector<8x8xi32> to vector<8x8xf32>
    %224 = vector.broadcast %185 : vector<8x1xf32> to vector<8x8xf32>
    %225 = arith.mulf %224, %223 : vector<8x8xf32>
    %226 = arith.extui %197 : vector<8x8xi1> to vector<8x8xi32>
    %227 = arith.sitofp %226 : vector<8x8xi32> to vector<8x8xf32>
    %228 = vector.broadcast %221 : vector<8x1xf32> to vector<8x8xf32>
    %229 = arith.mulf %228, %227 : vector<8x8xf32>
    %230 = arith.addf %225, %229 : vector<8x8xf32>
    %c0_62 = arith.constant 0 : index
    %c0_63 = arith.constant 0 : index
    %231 = vector.load %arg10[%c0_62, %c0_63] : memref<64x2048xbf16, #tpu.memory_space<vmem>>, vector<64x2048xbf16>
    %cst_64 = arith.constant dense<0.000000e+00> : vector<8x2048xf32>
    %232 = tpu.matmul %148, %231, %cst_64 {dimension_numbers = #tpu.dot_dimension_numbers<[1], [0], [0], [1], [0, 0, 1, 1], [], []>} : vector<8x64xbf16>, vector<64x2048xbf16>, vector<8x2048xf32> -> vector<8x2048xf32>
    %233 = vector.extract_strided_slice %232 {offsets = [0, 0], sizes = [8, 128], strides = [1, 1]} : vector<8x2048xf32> to vector<8x128xf32>
    %234 = vector.extract_strided_slice %232 {offsets = [0, 128], sizes = [8, 128], strides = [1, 1]} : vector<8x2048xf32> to vector<8x128xf32>
    %235 = arith.negf %233 : vector<8x128xf32>
    %236 = math.exp %235 : vector<8x128xf32>
    %cst_65 = arith.constant 1.000000e+00 : f32
    %237 = vector.broadcast %cst_65 : f32 to vector<8x128xf32>
    %238 = arith.addf %237, %236 : vector<8x128xf32>
    %239 = arith.divf %237, %238 : vector<8x128xf32>
    %240 = arith.mulf %233, %239 : vector<8x128xf32>
    %241 = arith.mulf %240, %234 : vector<8x128xf32>
    %242 = vector.extract_strided_slice %230 {offsets = [0, 0], sizes = [8, 1], strides = [1, 1]} : vector<8x8xf32> to vector<8x1xf32>
    %243 = vector.broadcast %242 : vector<8x1xf32> to vector<8x128xf32>
    %244 = arith.mulf %241, %243 : vector<8x128xf32>
    %245 = vector.extract_strided_slice %232 {offsets = [0, 256], sizes = [8, 128], strides = [1, 1]} : vector<8x2048xf32> to vector<8x128xf32>
    %246 = vector.extract_strided_slice %232 {offsets = [0, 384], sizes = [8, 128], strides = [1, 1]} : vector<8x2048xf32> to vector<8x128xf32>
    %247 = arith.negf %245 : vector<8x128xf32>
    %248 = math.exp %247 : vector<8x128xf32>
    %cst_66 = arith.constant 1.000000e+00 : f32
    %249 = vector.broadcast %cst_66 : f32 to vector<8x128xf32>
    %250 = arith.addf %249, %248 : vector<8x128xf32>
    %251 = arith.divf %249, %250 : vector<8x128xf32>
    %252 = arith.mulf %245, %251 : vector<8x128xf32>
    %253 = arith.mulf %252, %246 : vector<8x128xf32>
    %254 = vector.extract_strided_slice %230 {offsets = [0, 1], sizes = [8, 1], strides = [1, 1]} : vector<8x8xf32> to vector<8x1xf32>
    %255 = vector.broadcast %254 : vector<8x1xf32> to vector<8x128xf32>
    %256 = arith.mulf %253, %255 : vector<8x128xf32>
    %257 = vector.extract_strided_slice %232 {offsets = [0, 512], sizes = [8, 128], strides = [1, 1]} : vector<8x2048xf32> to vector<8x128xf32>
    %258 = vector.extract_strided_slice %232 {offsets = [0, 640], sizes = [8, 128], strides = [1, 1]} : vector<8x2048xf32> to vector<8x128xf32>
    %259 = arith.negf %257 : vector<8x128xf32>
    %260 = math.exp %259 : vector<8x128xf32>
    %cst_67 = arith.constant 1.000000e+00 : f32
    %261 = vector.broadcast %cst_67 : f32 to vector<8x128xf32>
    %262 = arith.addf %261, %260 : vector<8x128xf32>
    %263 = arith.divf %261, %262 : vector<8x128xf32>
    %264 = arith.mulf %257, %263 : vector<8x128xf32>
    %265 = arith.mulf %264, %258 : vector<8x128xf32>
    %266 = vector.extract_strided_slice %230 {offsets = [0, 2], sizes = [8, 1], strides = [1, 1]} : vector<8x8xf32> to vector<8x1xf32>
    %267 = vector.broadcast %266 : vector<8x1xf32> to vector<8x128xf32>
    %268 = arith.mulf %265, %267 : vector<8x128xf32>
    %269 = vector.extract_strided_slice %232 {offsets = [0, 768], sizes = [8, 128], strides = [1, 1]} : vector<8x2048xf32> to vector<8x128xf32>
    %270 = vector.extract_strided_slice %232 {offsets = [0, 896], sizes = [8, 128], strides = [1, 1]} : vector<8x2048xf32> to vector<8x128xf32>
    %271 = arith.negf %269 : vector<8x128xf32>
    %272 = math.exp %271 : vector<8x128xf32>
    %cst_68 = arith.constant 1.000000e+00 : f32
    %273 = vector.broadcast %cst_68 : f32 to vector<8x128xf32>
    %274 = arith.addf %273, %272 : vector<8x128xf32>
    %275 = arith.divf %273, %274 : vector<8x128xf32>
    %276 = arith.mulf %269, %275 : vector<8x128xf32>
    %277 = arith.mulf %276, %270 : vector<8x128xf32>
    %278 = vector.extract_strided_slice %230 {offsets = [0, 3], sizes = [8, 1], strides = [1, 1]} : vector<8x8xf32> to vector<8x1xf32>
    %279 = vector.broadcast %278 : vector<8x1xf32> to vector<8x128xf32>
    %280 = arith.mulf %277, %279 : vector<8x128xf32>
    %281 = vector.extract_strided_slice %232 {offsets = [0, 1024], sizes = [8, 128], strides = [1, 1]} : vector<8x2048xf32> to vector<8x128xf32>
    %282 = vector.extract_strided_slice %232 {offsets = [0, 1152], sizes = [8, 128], strides = [1, 1]} : vector<8x2048xf32> to vector<8x128xf32>
    %283 = arith.negf %281 : vector<8x128xf32>
    %284 = math.exp %283 : vector<8x128xf32>
    %cst_69 = arith.constant 1.000000e+00 : f32
    %285 = vector.broadcast %cst_69 : f32 to vector<8x128xf32>
    %286 = arith.addf %285, %284 : vector<8x128xf32>
    %287 = arith.divf %285, %286 : vector<8x128xf32>
    %288 = arith.mulf %281, %287 : vector<8x128xf32>
    %289 = arith.mulf %288, %282 : vector<8x128xf32>
    %290 = vector.extract_strided_slice %230 {offsets = [0, 4], sizes = [8, 1], strides = [1, 1]} : vector<8x8xf32> to vector<8x1xf32>
    %291 = vector.broadcast %290 : vector<8x1xf32> to vector<8x128xf32>
    %292 = arith.mulf %289, %291 : vector<8x128xf32>
    %293 = vector.extract_strided_slice %232 {offsets = [0, 1280], sizes = [8, 128], strides = [1, 1]} : vector<8x2048xf32> to vector<8x128xf32>
    %294 = vector.extract_strided_slice %232 {offsets = [0, 1408], sizes = [8, 128], strides = [1, 1]} : vector<8x2048xf32> to vector<8x128xf32>
    %295 = arith.negf %293 : vector<8x128xf32>
    %296 = math.exp %295 : vector<8x128xf32>
    %cst_70 = arith.constant 1.000000e+00 : f32
    %297 = vector.broadcast %cst_70 : f32 to vector<8x128xf32>
    %298 = arith.addf %297, %296 : vector<8x128xf32>
    %299 = arith.divf %297, %298 : vector<8x128xf32>
    %300 = arith.mulf %293, %299 : vector<8x128xf32>
    %301 = arith.mulf %300, %294 : vector<8x128xf32>
    %302 = vector.extract_strided_slice %230 {offsets = [0, 5], sizes = [8, 1], strides = [1, 1]} : vector<8x8xf32> to vector<8x1xf32>
    %303 = vector.broadcast %302 : vector<8x1xf32> to vector<8x128xf32>
    %304 = arith.mulf %301, %303 : vector<8x128xf32>
    %305 = vector.extract_strided_slice %232 {offsets = [0, 1536], sizes = [8, 128], strides = [1, 1]} : vector<8x2048xf32> to vector<8x128xf32>
    %306 = vector.extract_strided_slice %232 {offsets = [0, 1664], sizes = [8, 128], strides = [1, 1]} : vector<8x2048xf32> to vector<8x128xf32>
    %307 = arith.negf %305 : vector<8x128xf32>
    %308 = math.exp %307 : vector<8x128xf32>
    %cst_71 = arith.constant 1.000000e+00 : f32
    %309 = vector.broadcast %cst_71 : f32 to vector<8x128xf32>
    %310 = arith.addf %309, %308 : vector<8x128xf32>
    %311 = arith.divf %309, %310 : vector<8x128xf32>
    %312 = arith.mulf %305, %311 : vector<8x128xf32>
    %313 = arith.mulf %312, %306 : vector<8x128xf32>
    %314 = vector.extract_strided_slice %230 {offsets = [0, 6], sizes = [8, 1], strides = [1, 1]} : vector<8x8xf32> to vector<8x1xf32>
    %315 = vector.broadcast %314 : vector<8x1xf32> to vector<8x128xf32>
    %316 = arith.mulf %313, %315 : vector<8x128xf32>
    %317 = vector.extract_strided_slice %232 {offsets = [0, 1792], sizes = [8, 128], strides = [1, 1]} : vector<8x2048xf32> to vector<8x128xf32>
    %318 = vector.extract_strided_slice %232 {offsets = [0, 1920], sizes = [8, 128], strides = [1, 1]} : vector<8x2048xf32> to vector<8x128xf32>
    %319 = arith.negf %317 : vector<8x128xf32>
    %320 = math.exp %319 : vector<8x128xf32>
    %cst_72 = arith.constant 1.000000e+00 : f32
    %321 = vector.broadcast %cst_72 : f32 to vector<8x128xf32>
    %322 = arith.addf %321, %320 : vector<8x128xf32>
    %323 = arith.divf %321, %322 : vector<8x128xf32>
    %324 = arith.mulf %317, %323 : vector<8x128xf32>
    %325 = arith.mulf %324, %318 : vector<8x128xf32>
    %326 = vector.extract_strided_slice %230 {offsets = [0, 7], sizes = [8, 1], strides = [1, 1]} : vector<8x8xf32> to vector<8x1xf32>
    %327 = vector.broadcast %326 : vector<8x1xf32> to vector<8x128xf32>
    %328 = arith.mulf %325, %327 : vector<8x128xf32>
    %329 = tpu.concatenate %244, %256, %268, %280, %292, %304, %316, %328 in 1 : vector<8x128xf32>, vector<8x128xf32>, vector<8x128xf32>, vector<8x128xf32>, vector<8x128xf32>, vector<8x128xf32>, vector<8x128xf32>, vector<8x128xf32> -> vector<8x1024xf32>
    %330 = arith.truncf %329 : vector<8x1024xf32> to vector<8x1024xbf16>
    %c0_73 = arith.constant 0 : index
    %c0_74 = arith.constant 0 : index
    %331 = vector.load %arg11[%c0_73, %c0_74] : memref<1024x64xbf16, #tpu.memory_space<vmem>>, vector<1024x64xbf16>
    %cst_75 = arith.constant dense<0.000000e+00> : vector<8x64xf32>
    %332 = tpu.matmul %330, %331, %cst_75 {dimension_numbers = #tpu.dot_dimension_numbers<[1], [0], [0], [1], [0, 0, 1, 1], [], []>} : vector<8x1024xbf16>, vector<1024x64xbf16>, vector<8x64xf32> -> vector<8x64xf32>
    %333 = arith.addf %332, %123 : vector<8x64xf32>
    %334 = tpu.concatenate %333, %123 in 1 : vector<8x64xf32>, vector<8x64xf32> -> vector<8x128xf32>
    %c0_76 = arith.constant 0 : index
    %c0_77 = arith.constant 0 : index
    %335 = vector.load %arg12[%c0_76, %c0_77] : memref<8x128xf32, #tpu.memory_space<vmem>>, vector<8x128xf32>
    tpu.vector_store %arg12[%c0_76, %c0_77], %334 {strides = array<i32>} : memref<8x128xf32, #tpu.memory_space<vmem>>, vector<8x128xf32>,
    return
  }
}

</mosaic_0001>

<bundles_post_ra>
// kernel: tpu_custom_call.1
= control target key start
LH: loop header
LB: loop body
LE: loop exit
PB: predicated region body
PF: predicated region fallthrough
CT: control target
= control target key end

     0   :  { %vm46_vm0 = vcmask 523264   ;;  %s3732_s0 = inlined_call_operand.vmem [shape: f32[8,64], index: 0, kind: input, shape index: {}]   ;;  %s3733_s1 = inlined_call_operand.vmem [shape: f32[8,128], index: 1, kind: input, shape index: {}]   ;;  %s3734_s2 = inlined_call_operand.vmem [shape: f32[8,128], index: 2, kind: input, shape index: {}]   ;;  %s3735_s3 = inlined_call_operand.vmem [shape: f32[1,64], index: 3, kind: input, shape index: {}]   ;;  %s3736_s4 = inlined_call_operand.vmem [shape: f32[1,64], index: 4, kind: input, shape index: {}]   ;;  %s3737_s5 = inlined_call_operand.vmem [shape: f32[1,64], index: 5, kind: input, shape index: {}]   ;;  %s3738_s6 = inlined_call_operand.vmem [shape: f32[1,64], index: 6, kind: input, shape index: {}]   ;;  %s3739_s7 = inlined_call_operand.vmem [shape: bf16[64,128], index: 7, kind: input, shape index: {}]   ;;  %s3740_s8 = inlined_call_operand.vmem [shape: bf16[64,64], index: 8, kind: input, shape index: {}]   ;;  %s3741_s9 = inlined_call_operand.vmem [shape: bf16[64,8], index: 9, kind: input, shape index: {}]   ;;  %s3742_s10 = inlined_call_operand.vmem [shape: bf16[64,2048], index: 10, kind: input, shape index: {}]   ;;  %s3743_s11 = inlined_call_operand.vmem [shape: bf16[1024,64], index: 11, kind: input, shape index: {}]   ;;  %s3744_s12 = inlined_call_operand.hbm [shape: f32[8,128], index: 12, kind: output, shape index: {}]  }
   0x1   :  { %v3089_v0 = vld [vmem:[%s3732_s0] sm:$0xff] }
   0x2   :  { %v47_v1 = vsel %vm46_vm0, %v3089_v0, 0.0 }
   0x3   :  { %48 = vadd.xlane.f32.xlu0 %v47_v1 }
   0x4   :  { %17 = vsyncpa [#allocation3], 0  ;;  %v2839_v7 = vld [vmem:[%s3739_s7 + $0x18] sm:$0xff]   ;;  %v3001_v8 = vmov 0.0   ;;  %vm3002_vm1 = vmmov 0   ;;  %v2840_v9 = vld [vmem:[%s3739_s7 + $0x10] sm:$0xff]   ;;  %v151_v26 = vlaneseq }
   0x5   :  { %2726 = vmatprep.subr.bf16.mxu0 %v3001_v8  ;;  %2734 = vmatprep.mubr.msk.bf16.mxu0 %vm3002_vm1, %v3001_v8  ;;  %v2841_v10 = vld [vmem:[%s3739_s7 + $0x8] sm:$0xff]   ;;  %v2842_v11 = vld [vmem:[%s3739_s7] sm:$0xff]   ;;  %s3003_s7 = smov 120   ;;  %s3004_s16 = smov 8   ;;  %vm196_vm4 = vcmask 130048   ;;  %vm389_vm6 = vcmask 64512  }
   0x6   :  { %2727 = vmatpush3.bf16.msra.mxu0 %v2839_v7  ;;  %2738 = vmatprep.subr.bf16.mxu1 %v3001_v8  ;;  %v2434_v16 = vld [vmem:[%s3735_s3] ss:$0 sm:$0xff]  ;;  %v3126_v27 = vand.u32 127, %v151_v26  ;;  %s3005_s19 = smov 112   ;;  %s3006_s20 = smov 64   ;;  %v383_v50 = vshrl.u32 %v151_v26, 7 }
   0x7   :  { %2728 = vmatprep.subr.bf16.mxu0 %v3001_v8  ;;  %2740 = vmatprep.mubr.msk.bf16.mxu1 %vm3002_vm1, %v3001_v8  ;;  %v2435_v18 = vld [vmem:[%s3736_s4] ss:$0 sm:$0xff]  ;;  %s3009_s21 = smov 32   ;;  %vm447_vm7 = vcmask 1043456   ;;  %s3010_s29 = smov 16   ;;  %vm638_vm8 = vcmask 261120  }
   0x8   :  { %v157_v28 = vand.u32 15, %v3126_v27  ;;  %v173_v30 = vld [vmem:[%s3733_s1] sm:$0xff]  ;;  %vm166_vm3 = vcmp.lt.s32.totalorder %v3126_v27, 96  ;;  %s3007_s1 = smov 96   ;;  %vm384_vm5 = vcmp.ge.s32.totalorder %v383_v50, %v3126_v27  ;;  %s3011_s30 = smov 48   ;;  %vm640_vm9 = vcmask 392192  }
   0x9   :  { %v175_v32 = vld [vmem:[%s3734_s2] sm:$0xff]  ;;  %s3008_s2 = smov 80  }
   0xa   :  { %2729 = vmatpush3.bf16.msra.mxu0 %v2840_v9  ;;  %vm165_vm2 = vcmp.lt.s32.totalorder %v157_v28, 8 }
   0xb   :  { %2730 = vmatprep.subr.bf16.mxu0 %v3001_v8 }
   0xe   :  { %2731 = vmatpush3.bf16.msra.mxu0 %v2841_v10 }
   0xf   :  { %2732 = vmatprep.subr.bf16.mxu0 %v3001_v8 }
  0x12   :  { %2733 = vmatpush3.bf16.msra.mxu0 %v2842_v11 }
  0x13   :  { %2750 = vmatprep.subr.bf16.mxu0 %v3001_v8 }
  0x8c   :  { %v49_v2 = vpop.xlane.xlu0 %48 }
  0x8d   :  { %v51_v3 = vmul.f32 0.015625, %v49_v2 }
  0x8f   :  { %v52_v4 = vsub.f32 %v3089_v0, %v51_v3 }
  0x91   :  { %v53_v5 = vmul.f32 %v52_v4, %v52_v4 }
  0x93   :  { %v54_v6 = vsel %vm46_vm0, %v53_v5, 0.0 }
  0x94   :  { %55 = vadd.xlane.f32.xlu0 %v54_v6 }
 0x11d   :  { %v56_v12 = vpop.xlane.xlu0 %55 }
 0x11e   :  { %v57_v13 = vmul.f32 0.015625, %v56_v12 }
 0x120   :  { %v58_v14 = vadd.f32 1e-05, %v57_v13 }
 0x122   :  { %2915 = vrsqrt.f32 %v58_v14 }
 0x12f   :  { %v2916_v15 = vpop.eup %2915 }
 0x130   :  { %v60_v17 = vmul.f32 %v2916_v15, %v52_v4 }
 0x132   :  { %v67_v19 = vmul.f32 %v2434_v16, %v60_v17 }
 0x134   :  { %v74_v20 = vadd.f32 %v2435_v18, %v67_v19 }
 0x136   :  { %v75_v21 = vpack.c.bf16 %v74_v20, %v74_v20 }
 0x138   :  { %2735 = vmatmul.mubr.msk.bf16.vlgmr.msra.gmra.mxu0 %vm46_vm0, %v75_v21 }
 0x139   :  { %2752 = vmatprep.mubr.msk.bf16.mxu0 %vm3002_vm1, %v3001_v8 }
 0x1f8   :  { %v145_v22 = vpop.f32.mrf.mxu0 }
 0x1f9   :  { %169 = vrot.lane.b32.xlu1 %v145_v22, %s3003_s7  ;;  %v174_v35 = vmul.f32 %v173_v30, %v145_v22 }
 0x1fa   :  { %v2736_v23 = vpop.f32.mrf.mxu0 }
 0x1fc   :  { %v148_v24 = vpop.f32.mrf.mxu0 }
 0x1fd   :  { %167 = vrot.lane.b32.xlu1 %v145_v22, %s3004_s16 }
 0x1fe   :  { %v2737_v25 = vpop.f32.mrf.mxu0 }
 0x26b   :  { %v170_v29 = vpop.permute.xlu1 %169 }
 0x26c   :  { %v171_v31 = vsub.f32 0.0, %v170_v29 }
 0x26f   :  { %v168_v33 = vpop.permute.xlu1 %167 }
 0x270   :  { %v172_v34 = vsel %vm165_vm2, %v171_v31, %v168_v33 }
 0x271   :  { %v176_v36 = vmul.f32 %v175_v32, %v172_v34 }
 0x273   :  { %v177_v37 = vadd.f32 %v176_v36, %v174_v35 }
 0x275   :  { %v178_v38 = vsel %vm166_vm3, %v177_v37, %v145_v22 }
 0x276   :  { %180 = vrot.lane.b32.xlu0 %v178_v38, %s3005_s19  ;;  %v3136_v39 = vpack.c.bf16 %v178_v38, %v178_v38 }
 0x278   :  { %194 = vrot.lane.b32.xlu1 %v3136_v39, %s3006_s20 }
 0x2e8   :  { %v181_v40 = vpop.permute.xlu0 %180 }
 0x2e9   :  { %v3140_v41 = vpack.c.bf16 %v181_v40, %v181_v40 }
 0x2ea   :  { %v195_v42 = vpop.permute.xlu1 %194 }
 0x2eb   :  { %287 = vrot.lane.b32.xlu1 %v3140_v41, %s3006_s20  ;;  %v201_v43 = vsel %vm196_vm4, %v195_v42, 0 }
 0x2ec   :  { %2739 = vmatpush3.bf16.xpose.msra.mxu1 %v201_v43 }
 0x2ed   :  { %2744 = vmatprep.subr.bf16.mxu1 %v3001_v8 }
 0x2ef   :  { %183 = vrot.lane.b32.xlu1 %v178_v38, %s3007_s1 }
 0x2f3   :  { %186 = vrot.lane.b32.xlu1 %v178_v38, %s3008_s2  ;;  %2741 = vmatmul.mubr.msk.bf16.vlgmr.msra.gmra.mxu1 %vm196_vm4, %v3136_v39 }
 0x2f4   :  { %2745 = vmatpush3.bf16.xpose.msra.mxu1 %v201_v43  ;;  %2746 = vmatprep.mubr.msk.bf16.mxu1 %vm3002_vm1, %v3001_v8 }
 0x2f5   :  { %2756 = vmatprep.subr.bf16.mxu1 %v3001_v8 }
 0x2fb   :  { %2747 = vmatmul.mubr.msk.bf16.vlgmr.msra.gmra.mxu1 %vm196_vm4, %v3140_v41 }
 0x2fc   :  { %2758 = vmatprep.mubr.msk.bf16.mxu1 %vm3002_vm1, %v3001_v8 }
 0x35d   :  { %v288_v44 = vpop.permute.xlu1 %287 }
 0x35e   :  { %v293_v45 = vsel %vm196_vm4, %v288_v44, 0 }
 0x35f   :  { %2751 = vmatpush3.bf16.xpose.msra.mxu0 %v293_v45  ;;  %2757 = vmatpush3.bf16.xpose.msra.mxu1 %v293_v45 }
 0x360   :  { %2762 = vmatprep.subr.bf16.mxu0 %v3001_v8  ;;  %2768 = vmatprep.subr.bf16.mxu1 %v3001_v8 }
 0x361   :  { %v184_v46 = vpop.permute.xlu1 %183 }
 0x362   :  { %v191_v47 = vpack.c.bf16 %v184_v46, %v184_v46 }
 0x365   :  { %v187_v48 = vpop.permute.xlu1 %186 }
 0x366   :  { %v192_v49 = vpack.c.bf16 %v187_v48, %v187_v48  ;;  %2753 = vmatmul.mubr.msk.bf16.vlgmr.msra.gmra.mxu0 %vm196_vm4, %v191_v47 }
 0x367   :  { %2764 = vmatprep.mubr.msk.bf16.mxu0 %vm3002_vm1, %v3001_v8 }
 0x368   :  { %2759 = vmatmul.mubr.msk.bf16.vlgmr.msra.gmra.mxu1 %vm196_vm4, %v192_v49 }
 0x369   :  { %2770 = vmatprep.mubr.msk.bf16.mxu1 %vm3002_vm1, %v3001_v8 }
 0x3b3   :  { %v237_v51 = vpop.f32.mrf.mxu1 }
 0x3b4   :  { %v378_v52 = vmul.f32 0.25, %v237_v51 }
 0x3b5   :  { %v2742_v53 = vpop.f32.mrf.mxu1 }
 0x3b6   :  { %v385_v54 = vsel %vm384_vm5, %v378_v52, -inf }
 0x3b7   :  { %v240_v55 = vpop.f32.mrf.mxu1  ;;  %v390_v56 = vsel %vm389_vm6, %v385_v54, -inf }
 0x3b8   :  { %391 = vmax.xlane.f32.xlu1 %v390_v56 }
 0x3b9   :  { %v2743_v57 = vpop.f32.mrf.mxu1 }
 0x3bb   :  { %v280_v58 = vpop.f32.mrf.mxu1 }
 0x3bc   :  { %v379_v59 = vmul.f32 0.25, %v280_v58  ;;  %v2843_v58 = vld [vmem:[%s3740_s8 + $0x18] sm:$0xff]  }
 0x3bd   :  { %v2748_v60 = vpop.f32.mrf.mxu1 }
 0x3be   :  { %v386_v61 = vsel %vm384_vm5, %v379_v59, -inf  ;;  %v2844_v59 = vld [vmem:[%s3740_s8 + $0x10] sm:$0xff]   ;;  %v2845_v60 = vld [vmem:[%s3740_s8 + $0x8] sm:$0xff]  }
 0x3bf   :  { %v283_v62 = vpop.f32.mrf.mxu1  ;;  %v393_v63 = vsel %vm389_vm6, %v386_v61, -inf }
 0x3c0   :  { %394 = vmax.xlane.f32.xlu0 %v393_v63 }
 0x3c1   :  { %v2749_v1 = vpop.f32.mrf.mxu1 }
 0x426   :  { %v329_v2 = vpop.f32.mrf.mxu0 }
 0x427   :  { %v380_v3 = vmul.f32 0.25, %v329_v2 }
 0x428   :  { %v2754_v4 = vpop.f32.mrf.mxu0  ;;  %v372_v5 = vpop.f32.mrf.mxu1 }
 0x429   :  { %v381_v6 = vmul.f32 0.25, %v372_v5  ;;  %v387_v7 = vsel %vm384_vm5, %v380_v3, -inf }
 0x42a   :  { %v332_v9 = vpop.f32.mrf.mxu0  ;;  %v2760_v10 = vpop.f32.mrf.mxu1  ;;  %v396_v11 = vsel %vm389_vm6, %v387_v7, -inf }
 0x42b   :  { %397 = vmax.xlane.f32.xlu1 %v396_v11  ;;  %v388_v12 = vsel %vm384_vm5, %v381_v6, -inf }
 0x42c   :  { %v2755_v13 = vpop.f32.mrf.mxu0  ;;  %v375_v14 = vpop.f32.mrf.mxu1  ;;  %v399_v15 = vsel %vm389_vm6, %v388_v12, -inf }
 0x42d   :  { %400 = vmax.xlane.f32.xlu0 %v399_v15 }
 0x42e   :  { %v2761_v16 = vpop.f32.mrf.mxu1 }
 0x441   :  { %v392_v17 = vpop.xlane.xlu1 %391 }
 0x442   :  { %v402_v18 = vsub.f32 %v385_v54, %v392_v17 }
 0x444   :  { %v406_v19 = vmul.f32 1.442695, %v402_v18 }
 0x446   :  { %2917 = vpow2.f32 %v406_v19 }
 0x449   :  { %v395_v20 = vpop.xlane.xlu0 %394 }
 0x44a   :  { %v403_v21 = vsub.f32 %v386_v61, %v395_v20  ;;  %v2846_v61 = vld [vmem:[%s3740_s8] sm:$0xff]  }
 0x44c   :  { %v408_v22 = vmul.f32 1.442695, %v403_v21 }
 0x44e   :  { %2919 = vpow2.f32 %v408_v22 }
 0x453   :  { %v2918_v23 = vpop.eup %2917 }
 0x454   :  { %v414_v24 = vsel %vm389_vm6, %v2918_v23, 0.0 }
 0x455   :  { %415 = vadd.xlane.f32.xlu1 %v414_v24 }
 0x45b   :  { %v2920_v25 = vpop.eup %2919 }
 0x45c   :  { %v417_v26 = vsel %vm389_vm6, %v2920_v25, 0.0 }
 0x45d   :  { %418 = vadd.xlane.f32.xlu0 %v417_v26 }
 0x4b4   :  { %v398_v28 = vpop.xlane.xlu1 %397 }
 0x4b5   :  { %v404_v29 = vsub.f32 %v387_v7, %v398_v28 }
 0x4b6   :  { %v401_v30 = vpop.xlane.xlu0 %400 }
 0x4b7   :  { %v410_v31 = vmul.f32 1.442695, %v404_v29  ;;  %v405_v32 = vsub.f32 %v388_v12, %v401_v30 }
 0x4b9   :  { %2921 = vpow2.f32 %v410_v31  ;;  %v412_v33 = vmul.f32 1.442695, %v405_v32 }
 0x4bb   :  { %2923 = vpow2.f32 %v412_v33 }
 0x4c6   :  { %v2922_v34 = vpop.eup %2921 }
 0x4c7   :  { %v420_v35 = vsel %vm389_vm6, %v2922_v34, 0.0 }
 0x4c8   :  { %v2924_v36 = vpop.eup %2923  ;;  %421 = vadd.xlane.f32.xlu1 %v420_v35  ;;  %v973_v35 = vld [vmem:[%s3742_s10 + $0x1c0] sm:$0xff] }
 0x4c9   :  { %v423_v37 = vsel %vm389_vm6, %v2924_v36, 0.0 }
 0x4ca   :  { %424 = vadd.xlane.f32.xlu0 %v423_v37 }
 0x4d9   :  { %442 = vrot.lane.b32.xlu1 %v3136_v39, %s3009_s21 }
 0x4de   :  { %v416_v38 = vpop.xlane.xlu1 %415 }
 0x4df   :  { %2925 = vrcp.f32 %v416_v38  ;;  %v2847_v38 = vld [vmem:[%s3741_s9 + $0x18] sm:$0xff]  }
 0x4e0   :  { %534 = vrot.lane.b32.xlu0 %v3140_v41, %s3009_s21 }
 0x4e6   :  { %v419_v40 = vpop.xlane.xlu0 %418 }
 0x4e7   :  { %2927 = vrcp.f32 %v419_v40  ;;  %v949_v40 = vld [vmem:[%s3742_s10 + $0x100] sm:$0xff] }
 0x4ec   :  { %v2926_v42 = vpop.eup %2925 }
 0x4ed   :  { %v434_v46 = vmul.f32 %v2926_v42, %v2918_v23  ;;  %v957_v42 = vld [vmem:[%s3742_s10 + $0x140] sm:$0xff] }
 0x4ef   :  { %v438_v39 = vpack.c.bf16 %v434_v46, %v434_v46  ;;  %v933_v46 = vld [vmem:[%s3742_s10 + $0x80] sm:$0xff] }
 0x4f4   :  { %v2928_v43 = vpop.eup %2927 }
 0x4f5   :  { %v435_v47 = vmul.f32 %v2928_v43, %v2920_v25  ;;  %v2496_v43 = vcombine.high %v949_v40, %v957_v42 }
 0x4f7   :  { %v439_v41 = vpack.c.bf16 %v435_v47, %v435_v47  ;;  %v941_v47 = vld [vmem:[%s3742_s10 + $0xc0] sm:$0xff] }
 0x551   :  { %v422_v44 = vpop.xlane.xlu1 %421 }
 0x552   :  { %2929 = vrcp.f32 %v422_v44  ;;  %v2495_v44 = vcombine.low %v949_v40, %v957_v42 }
 0x553   :  { %v425_v45 = vpop.xlane.xlu0 %424 }
 0x554   :  { %2931 = vrcp.f32 %v425_v45  ;;  %v2848_v45 = vld [vmem:[%s3741_s9 + $0x10] sm:$0xff]  }
 0x555   :  { %v443_v48 = vpop.permute.xlu1 %442 }
 0x556   :  { %v449_v49 = vsel %vm447_vm7, %v443_v48, 0  ;;  %v2480_v48 = vcombine.high %v933_v46, %v941_v47 }
 0x557   :  { %v535_v50 = vpop.permute.xlu0 %534  ;;  %2763 = vmatpush3.bf16.msra.mxu0 %v449_v49  ;;  %2769 = vmatpush3.bf16.msra.mxu1 %v449_v49  ;;  %v2479_v49 = vcombine.low %v933_v46, %v941_v47  ;;  %v953_v46 = vld [vmem:[%s3742_s10 + $0x120] sm:$0xff] }
 0x558   :  { %2774 = vmatprep.subr.bf16.mxu0 %v3001_v8  ;;  %2780 = vmatprep.subr.bf16.mxu1 %v3001_v8  ;;  %v540_v51 = vsel %vm447_vm7, %v535_v50, 0  ;;  %v2849_v50 = vld [vmem:[%s3741_s9 + $0x8] sm:$0xff]   ;;  %v961_v47 = vld [vmem:[%s3742_s10 + $0x160] sm:$0xff] }
 0x55a   :  { %2765 = vmatmul.mubr.msk.bf16.vlgmr.msra.gmra.mxu0 %vm389_vm6, %v438_v39  ;;  %2771 = vmatmul.mubr.msk.bf16.vlgmr.msra.gmra.mxu1 %vm389_vm6, %v439_v41  ;;  %v917_v39 = vld [vmem:[%s3742_s10] sm:$0xff] }
 0x55b   :  { %2775 = vmatpush3.bf16.msra.mxu0 %v540_v51  ;;  %2781 = vmatpush3.bf16.msra.mxu1 %v540_v51  ;;  %v925_v41 = vld [vmem:[%s3742_s10 + $0x40] sm:$0xff] }
 0x55c   :  { %2776 = vmatprep.mubr.msk.bf16.mxu0 %vm3002_vm1, %v3001_v8  ;;  %2782 = vmatprep.mubr.msk.bf16.mxu1 %vm3002_vm1, %v3001_v8  ;;  %v2464_v51 = vcombine.high %v917_v39, %v925_v41 }
 0x55d   :  { %2786 = vmatprep.subr.bf16.mxu0 %v3001_v8  ;;  %2798 = vmatprep.subr.bf16.mxu1 %v3001_v8 }
 0x55f   :  { %v2930_v52 = vpop.eup %2929 }
 0x560   :  { %v436_v53 = vmul.f32 %v2930_v52, %v2922_v34  ;;  %v2463_v52 = vcombine.low %v917_v39, %v925_v41  ;;  %v2504_v39 = vcombine.high %v953_v46, %v961_v47  ;;  %v936_v41 = vld [vmem:[%s3742_s10 + $0x98] sm:$0xff] }
 0x561   :  { %v2932_v54 = vpop.eup %2931 }
 0x562   :  { %v440_v55 = vpack.c.bf16 %v436_v53, %v436_v53  ;;  %v437_v56 = vmul.f32 %v2932_v54, %v2924_v36  ;;  %v2850_v53 = vld [vmem:[%s3741_s9] sm:$0xff]   ;;  %v966_v54 = vld [vmem:[%s3742_s10 + $0x188] sm:$0xff] }
 0x564   :  { %2777 = vmatmul.mubr.msk.bf16.vlgmr.msra.gmra.mxu0 %vm389_vm6, %v440_v55  ;;  %v441_v57 = vpack.c.bf16 %v437_v56, %v437_v56  ;;  %v974_v55 = vld [vmem:[%s3742_s10 + $0x1c8] sm:$0xff]  ;;  %v967_v56 = vld [vmem:[%s3742_s10 + $0x190] sm:$0xff] }
 0x565   :  { %2794 = vmatprep.mubr.msk.bf16.mxu0 %vm3002_vm1, %v3001_v8  ;;  %2787 = vmatpush3.bf16.msra.mxu0 %v2843_v58  ;;  %v975_v58 = vld [vmem:[%s3742_s10 + $0x1d0] sm:$0xff] }
 0x566   :  { %2783 = vmatmul.mubr.msk.bf16.vlgmr.msra.gmra.mxu1 %vm389_vm6, %v441_v57  ;;  %2788 = vmatprep.subr.bf16.mxu0 %v3001_v8  ;;  %v2514_v57 = vcombine.high %v966_v54, %v974_v55 }
 0x567   :  { %2806 = vmatprep.mubr.msk.bf16.mxu1 %vm3002_vm1, %v3001_v8  ;;  %2799 = vmatpush3.bf16.msra.mxu1 %v2847_v38 }
 0x568   :  { %2800 = vmatprep.subr.bf16.mxu1 %v3001_v8 }
 0x569   :  { %2789 = vmatpush3.bf16.msra.mxu0 %v2844_v59  ;;  %v2513_v59 = vcombine.low %v966_v54, %v974_v55  ;;  %v2503_v55 = vcombine.low %v953_v46, %v961_v47  ;;  %v956_v46 = vld [vmem:[%s3742_s10 + $0x138] sm:$0xff] }
 0x56a   :  { %2790 = vmatprep.subr.bf16.mxu0 %v3001_v8  ;;  %v964_v47 = vld [vmem:[%s3742_s10 + $0x178] sm:$0xff] }
 0x56b   :  { %2801 = vmatpush3.bf16.msra.mxu1 %v2848_v45  ;;  %v960_v45 = vld [vmem:[%s3742_s10 + $0x158] sm:$0xff] }
 0x56c   :  { %2802 = vmatprep.subr.bf16.mxu1 %v3001_v8 }
 0x56d   :  { %2791 = vmatpush3.bf16.msra.mxu0 %v2845_v60  ;;  %v2515_v60 = vcombine.low %v967_v56, %v975_v58 }
 0x56e   :  { %2792 = vmatprep.subr.bf16.mxu0 %v3001_v8 }
 0x56f   :  { %2803 = vmatpush3.bf16.msra.mxu1 %v2849_v50 }
 0x570   :  { %2804 = vmatprep.subr.bf16.mxu1 %v3001_v8 }
 0x571   :  { %2793 = vmatpush3.bf16.msra.mxu0 %v2846_v61  ;;  %v2516_v61 = vcombine.high %v967_v56, %v975_v58  ;;  %v920_v58 = vld [vmem:[%s3742_s10 + $0x18] sm:$0xff] }
 0x573   :  { %2805 = vmatpush3.bf16.msra.mxu1 %v2850_v53  ;;  %v945_v53 = vld [vmem:[%s3742_s10 + $0xe0] sm:$0xff] }
 0x574   :  { %1350 = vmatprep.subr.bf16.mxu1 %v2514_v57 }
 0x61a   :  { %v485_v62 = vpop.f32.mrf.mxu0  ;;  %v528_v63 = vpop.f32.mrf.mxu1 }
 0x61b   :  { %626 = vrot.lane.b32.xlu1 %v528_v63, %s3010_s29 }
 0x61c   :  { %v2766_v1 = vpop.f32.mrf.mxu0  ;;  %v2772_v2 = vpop.f32.mrf.mxu1 }
 0x61e   :  { %v488_v3 = vpop.f32.mrf.mxu0  ;;  %v531_v4 = vpop.f32.mrf.mxu1 }
 0x61f   :  { %v2454_v4 = vld [vmem:[%s3737_s5] ss:$0 sm:$0xff] }
 0x620   :  { %v2767_v5 = vpop.f32.mrf.mxu0  ;;  %v2773_v6 = vpop.f32.mrf.mxu1 }
 0x621   :  { %v2455_v6 = vld [vmem:[%s3738_s6] ss:$0 sm:$0xff] }
 0x624   :  { %v576_v7 = vpop.f32.mrf.mxu0 }
 0x625   :  { %630 = vrot.lane.b32.xlu1 %v576_v7, %s3009_s21 }
 0x626   :  { %v2778_v9 = vpop.f32.mrf.mxu0  ;;  %v619_v10 = vpop.f32.mrf.mxu1 }
 0x627   :  { %634 = vrot.lane.b32.xlu0 %v619_v10, %s3011_s30  ;;  %v950_v9 = vld [vmem:[%s3742_s10 + $0x108] sm:$0xff] }
 0x628   :  { %v579_v11 = vpop.f32.mrf.mxu0  ;;  %v2784_v12 = vpop.f32.mrf.mxu1  ;;  %v958_v10 = vld [vmem:[%s3742_s10 + $0x148] sm:$0xff] }
 0x629   :  { %v951_v11 = vld [vmem:[%s3742_s10 + $0x110] sm:$0xff] }
 0x62a   :  { %v2779_v13 = vpop.f32.mrf.mxu0  ;;  %v622_v14 = vpop.f32.mrf.mxu1  ;;  %v959_v12 = vld [vmem:[%s3742_s10 + $0x150] sm:$0xff] }
 0x62c   :  { %v2785_v15 = vpop.f32.mrf.mxu1 }
 0x62d   :  { %v2498_v15 = vcombine.high %v950_v9, %v958_v10 }
 0x68d   :  { %v627_v16 = vpop.permute.xlu1 %626 }
 0x68e   :  { %v637_v17 = vsel %vm196_vm4, %v485_v62, %v627_v16  ;;  %v3012_v62 = vmov 0   ;;  %v2500_v16 = vcombine.high %v951_v11, %v959_v12 }
 0x68f   :  { %2831 = vset.pattern.permute.xlu1 %v3012_v62 }
 0x697   :  { %v631_v18 = vpop.permute.xlu1 %630 }
 0x698   :  { %v639_v19 = vsel %vm638_vm8, %v637_v17, %v631_v18  ;;  %v934_v17 = vld [vmem:[%s3742_s10 + $0x88] sm:$0xff] }
 0x699   :  { %v635_v20 = vpop.permute.xlu0 %634  ;;  %v942_v18 = vld [vmem:[%s3742_s10 + $0xc8] sm:$0xff] }
 0x69a   :  { %v641_v21 = vsel %vm640_vm9, %v639_v19, %v635_v20  ;;  %v935_v19 = vld [vmem:[%s3742_s10 + $0x90] sm:$0xff] }
 0x69b   :  { %v642_v22 = vpack.c.bf16 %v641_v21, %v641_v21  ;;  %v943_v20 = vld [vmem:[%s3742_s10 + $0xd0] sm:$0xff]  ;;  %v2497_v21 = vcombine.low %v950_v9, %v958_v10 }
 0x69d   :  { %2795 = vmatmul.mubr.msk.bf16.vlgmr.msra.gmra.mxu0 %vm46_vm0, %v642_v22  ;;  %v2499_v22 = vcombine.low %v951_v11, %v959_v12 }
 0x69e   :  { %1333 = vmatprep.mubr.bf16.mxu0 %v3012_v62 }
 0x75d   :  { %v712_v23 = vpop.f32.mrf.mxu0 }
 0x75e   :  { %v3220_v24 = vadd.f32 %v712_v23, %v3089_v0  ;;  %v965_v0 = vld [vmem:[%s3742_s10 + $0x180] sm:$0xff]  ;;  %v2482_v23 = vcombine.high %v934_v17, %v942_v18 }
 0x75f   :  { %v2796_v25 = vpop.f32.mrf.mxu0  ;;  %v2512_v36 = vcombine.high %v965_v0, %v973_v35  ;;  %v2511_v37 = vcombine.low %v965_v0, %v973_v35  ;;  %v968_v0 = vld [vmem:[%s3742_s10 + $0x198] sm:$0xff] }
 0x760   :  { %v721_v26 = vsel %vm46_vm0, %v3220_v24, 0.0  ;;  %v2484_v25 = vcombine.high %v935_v19, %v943_v20  ;;  %v976_v35 = vld [vmem:[%s3742_s10 + $0x1d8] sm:$0xff] }
 0x761   :  { %722 = vadd.xlane.f32.xlu1 %v721_v26  ;;  %v715_v28 = vpop.f32.mrf.mxu0  ;;  %1309 = vmatprep.subr.bf16.mxu0 %v2512_v36  ;;  %v918_v26 = vld [vmem:[%s3742_s10 + $0x8] sm:$0xff]  ;;  %v969_v36 = vld [vmem:[%s3742_s10 + $0x1a0] sm:$0xff]  ;;  %v2518_v42 = vcombine.high %v968_v0, %v976_v35 }
 0x762   :  { %1310 = vmatpush1.bf16.msra.mxu0 %v2511_v37  ;;  %v926_v28 = vld [vmem:[%s3742_s10 + $0x48] sm:$0xff]  ;;  %v977_v37 = vld [vmem:[%s3742_s10 + $0x1e0] sm:$0xff] }
 0x763   :  { %v2797_v29 = vpop.f32.mrf.mxu0  ;;  %1311 = vmatprep.subr.bf16.mxu0 %v2496_v43  ;;  %v2465_v38 = vcombine.low %v918_v26, %v926_v28  ;;  %v2520_v43 = vcombine.high %v969_v36, %v977_v37 }
 0x764   :  { %v919_v29 = vld [vmem:[%s3742_s10 + $0x10] sm:$0xff] }
 0x766   :  { %1312 = vmatpush1.bf16.msra.mxu0 %v2495_v44  ;;  %v952_v44 = vld [vmem:[%s3742_s10 + $0x118] sm:$0xff] }
 0x767   :  { %1313 = vmatprep.subr.bf16.mxu0 %v2480_v48  ;;  %v2517_v48 = vcombine.low %v968_v0, %v976_v35  ;;  %v2502_v50 = vcombine.high %v952_v44, %v960_v45  ;;  %v2501_v54 = vcombine.low %v952_v44, %v960_v45  ;;  %v931_v0 = vld [vmem:[%s3742_s10 + $0x70] sm:$0xff] }
 0x76a   :  { %1314 = vmatpush1.bf16.msra.mxu0 %v2479_v49  ;;  %v2519_v49 = vcombine.low %v969_v36, %v977_v37 }
 0x76b   :  { %1315 = vmatprep.subr.bf16.mxu0 %v2464_v51  ;;  %v944_v51 = vld [vmem:[%s3742_s10 + $0xd8] sm:$0xff] }
 0x76c   :  { %v2486_v56 = vcombine.high %v936_v41, %v944_v51 }
 0x76e   :  { %1316 = vmatpush1.bf16.msra.mxu0 %v2463_v52  ;;  %v937_v52 = vld [vmem:[%s3742_s10 + $0xa0] sm:$0xff] }
 0x76f   :  { %1391 = vmatprep.subr.bf16.mxu0 %v2516_v61  ;;  %v2488_v57 = vcombine.high %v937_v52, %v945_v53  ;;  %v929_v61 = vld [vmem:[%s3742_s10 + $0x60] sm:$0xff] }
 0x7ea   :  { %v723_v30 = vpop.xlane.xlu1 %722 }
 0x7eb   :  { %v724_v31 = vmul.f32 0.015625, %v723_v30  ;;  %v927_v30 = vld [vmem:[%s3742_s10 + $0x50] sm:$0xff] }
 0x7ec   :  { %v2467_v40 = vcombine.low %v919_v29, %v927_v30 }
 0x7ed   :  { %v725_v32 = vsub.f32 %v3220_v24, %v724_v31  ;;  %v2481_v31 = vcombine.low %v934_v17, %v942_v18  ;;  %v963_v17 = vld [vmem:[%s3742_s10 + $0x170] sm:$0xff] }
 0x7ef   :  { %v726_v33 = vmul.f32 %v725_v32, %v725_v32 }
 0x7f1   :  { %v727_v34 = vsel %vm46_vm0, %v726_v33, 0.0  ;;  %v2466_v33 = vcombine.high %v918_v26, %v926_v28  ;;  %v947_v26 = vld [vmem:[%s3742_s10 + $0xf0] sm:$0xff] }
 0x7f2   :  { %728 = vadd.xlane.f32.xlu0 %v727_v34  ;;  %v2468_v34 = vcombine.high %v919_v29, %v927_v30 }
 0x87b   :  { %v729_v63 = vpop.xlane.xlu0 %728 }
 0x87c   :  { %v730_v1 = vmul.f32 0.015625, %v729_v63  ;;  %v2485_v63 = vcombine.low %v936_v41, %v944_v51  ;;  %v2509_v41 = vcombine.low %v956_v46, %v964_v47 }
 0x87e   :  { %v731_v2 = vadd.f32 1e-05, %v730_v1  ;;  %v2487_v1 = vcombine.low %v937_v52, %v945_v53  ;;  %v924_v52 = vld [vmem:[%s3742_s10 + $0x38] sm:$0xff] }
 0x87f   :  { %v932_v53 = vld [vmem:[%s3742_s10 + $0x78] sm:$0xff] }
 0x880   :  { %2933 = vrsqrt.f32 %v731_v2 }
 0x88d   :  { %v2934_v3 = vpop.eup %2933 }
 0x88e   :  { %v733_v5 = vmul.f32 %v2934_v3, %v725_v32  ;;  %v2483_v32 = vcombine.low %v935_v19, %v943_v20 }
 0x890   :  { %v740_v7 = vmul.f32 %v2454_v4, %v733_v5  ;;  %v970_v4 = vld [vmem:[%s3742_s10 + $0x1a8] sm:$0xff] }
 0x891   :  { %v978_v5 = vld [vmem:[%s3742_s10 + $0x1e8] sm:$0xff] }
 0x892   :  { %v747_v13 = vadd.f32 %v2455_v6, %v740_v7  ;;  %v971_v6 = vld [vmem:[%s3742_s10 + $0x1b0] sm:$0xff]  ;;  %v2522_v11 = vcombine.high %v970_v4, %v978_v5  ;;  %v2521_v18 = vcombine.low %v970_v4, %v978_v5 }
 0x893   :  { %v979_v7 = vld [vmem:[%s3742_s10 + $0x1f0] sm:$0xff] }
 0x894   :  { %v3297_v14 = vpack.c.bf16 %v747_v13, %v747_v13  ;;  %v2524_v12 = vcombine.high %v971_v6, %v979_v7  ;;  %v954_v13 = vld [vmem:[%s3742_s10 + $0x128] sm:$0xff]  ;;  %v2523_v19 = vcombine.low %v971_v6, %v979_v7 }
 0x896   :  { %2807 = vmatmul.mubr.msk.bf16.vlgmr.msra.gmra.mxu1 %vm46_vm0, %v3297_v14  ;;  %2527 = vmatmul.mubr.msk.bf16.vlgmr.msra.gmra.mxu0 %vm46_vm0, %v3297_v14 }
 0x897   :  { %1351 = vmatpush1.bf16.msra.mxu1 %v2513_v59  ;;  %1392 = vmatpush1.bf16.msra.mxu0 %v2515_v60  ;;  %v928_v59 = vld [vmem:[%s3742_s10 + $0x58] sm:$0xff]  ;;  %v921_v60 = vld [vmem:[%s3742_s10 + $0x20] sm:$0xff] }
 0x898   :  { %1352 = vmatprep.subr.bf16.mxu1 %v2498_v15  ;;  %1393 = vmatprep.subr.bf16.mxu0 %v2500_v16  ;;  %v2470_v2 = vcombine.high %v920_v58, %v928_v59  ;;  %v2472_v3 = vcombine.high %v921_v60, %v929_v61  ;;  %v2469_v9 = vcombine.low %v920_v58, %v928_v59  ;;  %v962_v15 = vld [vmem:[%s3742_s10 + $0x168] sm:$0xff]  ;;  %v955_v16 = vld [vmem:[%s3742_s10 + $0x130] sm:$0xff] }
 0x899   :  { %1374 = vmatprep.mubr.bf16.mxu1 %v3012_v62  ;;  %1415 = vmatprep.mubr.bf16.mxu0 %v3012_v62  ;;  %v2471_v10 = vcombine.low %v921_v60, %v929_v61  ;;  %v2506_v20 = vcombine.high %v954_v13, %v962_v15  ;;  %v2505_v28 = vcombine.low %v954_v13, %v962_v15 }
 0x89a   :  { %v2507_v29 = vcombine.low %v955_v16, %v963_v17 }
 0x89b   :  { %1353 = vmatpush1.bf16.msra.mxu1 %v2497_v21  ;;  %1394 = vmatpush1.bf16.msra.mxu0 %v2499_v22  ;;  %v2508_v21 = vcombine.high %v955_v16, %v963_v17  ;;  %v938_v22 = vld [vmem:[%s3742_s10 + $0xa8] sm:$0xff] }
 0x89c   :  { %1354 = vmatprep.subr.bf16.mxu1 %v2482_v23  ;;  %1395 = vmatprep.subr.bf16.mxu0 %v2484_v25  ;;  %v946_v23 = vld [vmem:[%s3742_s10 + $0xe8] sm:$0xff]  ;;  %v939_v25 = vld [vmem:[%s3742_s10 + $0xb0] sm:$0xff] }
 0x89d   :  { %v2490_v30 = vcombine.high %v938_v22, %v946_v23  ;;  %v2489_v35 = vcombine.low %v938_v22, %v946_v23  ;;  %v2491_v36 = vcombine.low %v939_v25, %v947_v26 }
 0x89f   :  { %1355 = vmatpush1.bf16.msra.mxu1 %v2481_v31  ;;  %1396 = vmatpush1.bf16.msra.mxu0 %v2483_v32  ;;  %v2492_v31 = vcombine.high %v939_v25, %v947_v26  ;;  %v922_v32 = vld [vmem:[%s3742_s10 + $0x28] sm:$0xff] }
 0x8a0   :  { %1356 = vmatprep.subr.bf16.mxu1 %v2466_v33  ;;  %1397 = vmatprep.subr.bf16.mxu0 %v2468_v34  ;;  %v930_v33 = vld [vmem:[%s3742_s10 + $0x68] sm:$0xff]  ;;  %v923_v34 = vld [vmem:[%s3742_s10 + $0x30] sm:$0xff] }
 0x8a1   :  { %v2474_v37 = vcombine.high %v922_v32, %v930_v33  ;;  %v2475_v44 = vcombine.low %v923_v34, %v931_v0 }
 0x8a3   :  { %1357 = vmatpush1.bf16.msra.mxu1 %v2465_v38  ;;  %1398 = vmatpush1.bf16.msra.mxu0 %v2467_v40  ;;  %v2476_v38 = vcombine.high %v923_v34, %v931_v0  ;;  %v972_v40 = vld [vmem:[%s3742_s10 + $0x1b8] sm:$0xff] }
 0x8a4   :  { %1432 = vmatprep.subr.bf16.mxu1 %v2518_v42  ;;  %1473 = vmatprep.subr.bf16.mxu0 %v2520_v43  ;;  %v980_v42 = vld [vmem:[%s3742_s10 + $0x1f8] sm:$0xff]  ;;  %v2473_v43 = vcombine.low %v922_v32, %v930_v33 }
 0x8a5   :  { %v2526_v45 = vcombine.high %v972_v40, %v980_v42 }
 0x8a6   :  { %2528 = vmatmul.mubr.msk.bf16.vlgmr.msra.gmra.mxu1 %vm46_vm0, %v3297_v14  ;;  %2529 = vmatmul.mubr.msk.bf16.vlgmr.msra.gmra.mxu0 %vm46_vm0, %v3297_v14 }
 0x8a7   :  { %1433 = vmatpush1.bf16.msra.mxu1 %v2517_v48  ;;  %1474 = vmatpush1.bf16.msra.mxu0 %v2519_v49  ;;  %v2525_v48 = vcombine.low %v972_v40, %v980_v42  ;;  %v2510_v49 = vcombine.high %v956_v46, %v964_v47 }
 0x8a8   :  { %1434 = vmatprep.subr.bf16.mxu1 %v2502_v50  ;;  %1475 = vmatprep.subr.bf16.mxu0 %v2504_v39  ;;  %v940_v50 = vld [vmem:[%s3742_s10 + $0xb8] sm:$0xff] }
 0x8a9   :  { %1456 = vmatprep.mubr.bf16.mxu1 %v3012_v62  ;;  %1497 = vmatprep.mubr.bf16.mxu0 %v3012_v62  ;;  %v948_v39 = vld [vmem:[%s3742_s10 + $0xf8] sm:$0xff] }
 0x8aa   :  { %v2494_v51 = vcombine.high %v940_v50, %v948_v39 }
 0x8ab   :  { %1435 = vmatpush1.bf16.msra.mxu1 %v2501_v54  ;;  %1476 = vmatpush1.bf16.msra.mxu0 %v2503_v55  ;;  %v2493_v54 = vcombine.low %v940_v50, %v948_v39  ;;  %v2478_v55 = vcombine.high %v924_v52, %v932_v53 }
 0x8ac   :  { %1436 = vmatprep.subr.bf16.mxu1 %v2486_v56  ;;  %1477 = vmatprep.subr.bf16.mxu0 %v2488_v57  ;;  %v2477_v56 = vcombine.low %v924_v52, %v932_v53 }
 0x8af   :  { %1437 = vmatpush1.bf16.msra.mxu1 %v2485_v63  ;;  %1478 = vmatpush1.bf16.msra.mxu0 %v2487_v1 }
 0x8b0   :  { %1438 = vmatprep.subr.bf16.mxu1 %v2470_v2  ;;  %1479 = vmatprep.subr.bf16.mxu0 %v2472_v3 }
 0x8b3   :  { %1439 = vmatpush1.bf16.msra.mxu1 %v2469_v9  ;;  %1480 = vmatpush1.bf16.msra.mxu0 %v2471_v10 }
 0x8b4   :  { %1514 = vmatprep.subr.bf16.mxu1 %v2522_v11  ;;  %1555 = vmatprep.subr.bf16.mxu0 %v2524_v12 }
 0x8b6   :  { %2530 = vmatmul.mubr.msk.bf16.vlgmr.msra.gmra.mxu1 %vm46_vm0, %v3297_v14  ;;  %2531 = vmatmul.mubr.msk.bf16.vlgmr.msra.gmra.mxu0 %vm46_vm0, %v3297_v14 }
 0x8b7   :  { %1515 = vmatpush1.bf16.msra.mxu1 %v2521_v18  ;;  %1556 = vmatpush1.bf16.msra.mxu0 %v2523_v19 }
 0x8b8   :  { %1516 = vmatprep.subr.bf16.mxu1 %v2506_v20  ;;  %1557 = vmatprep.subr.bf16.mxu0 %v2508_v21 }
 0x8b9   :  { %1538 = vmatprep.mubr.bf16.mxu1 %v3012_v62  ;;  %1579 = vmatprep.mubr.bf16.mxu0 %v3012_v62 }
 0x8bb   :  { %1517 = vmatpush1.bf16.msra.mxu1 %v2505_v28  ;;  %1558 = vmatpush1.bf16.msra.mxu0 %v2507_v29 }
 0x8bc   :  { %1518 = vmatprep.subr.bf16.mxu1 %v2490_v30  ;;  %1559 = vmatprep.subr.bf16.mxu0 %v2492_v31 }
 0x8bf   :  { %1519 = vmatpush1.bf16.msra.mxu1 %v2489_v35  ;;  %1560 = vmatpush1.bf16.msra.mxu0 %v2491_v36 }
 0x8c0   :  { %1520 = vmatprep.subr.bf16.mxu1 %v2474_v37  ;;  %1561 = vmatprep.subr.bf16.mxu0 %v2476_v38 }
 0x8c3   :  { %1521 = vmatpush1.bf16.msra.mxu1 %v2473_v43  ;;  %1562 = vmatpush1.bf16.msra.mxu0 %v2475_v44 }
 0x8c4   :  { %1596 = vmatprep.subr.bf16.mxu1 %v2526_v45 }
 0x8c6   :  { %2532 = vmatmul.mubr.msk.bf16.vlgmr.msra.gmra.mxu1 %vm46_vm0, %v3297_v14  ;;  %2533 = vmatmul.mubr.msk.bf16.vlgmr.msra.gmra.mxu0 %vm46_vm0, %v3297_v14 }
 0x8c7   :  { %1597 = vmatpush1.bf16.msra.mxu1 %v2525_v48  ;;  %1620 = vmatprep.mubr.bf16.mxu1 %v3012_v62 }
 0x8c8   :  { %1598 = vmatprep.subr.bf16.mxu1 %v2510_v49 }
 0x8cb   :  { %1599 = vmatpush1.bf16.msra.mxu1 %v2509_v41 }
 0x8cc   :  { %1600 = vmatprep.subr.bf16.mxu1 %v2494_v51 }
 0x8cf   :  { %1601 = vmatpush1.bf16.msra.mxu1 %v2493_v54 }
 0x8d0   :  { %1602 = vmatprep.subr.bf16.mxu1 %v2478_v55 }
 0x8d3   :  { %1603 = vmatpush1.bf16.msra.mxu1 %v2477_v56 }
 0x8d6   :  { %2534 = vmatmul.mubr.msk.bf16.vlgmr.msra.gmra.mxu1 %vm46_vm0, %v3297_v14 }
 0x956   :  { %v3468_v62 = vpop.f32.mrf.mxu1  ;;  %v1335_v57 = vpop.f32.mrf.mxu0 }
 0x957   :  { %v2535_v58 = vmul.f32 -1.442695, %v1335_v57  ;;  %v824_v59 = vsel %vm389_vm6, %v3468_v62, -inf }
 0x958   :  { %825 = vmax.xlane.f32.xlu0 %v824_v59  ;;  %v2808_v60 = vpop.f32.mrf.mxu1  ;;  %v1337_v61 = vpop.f32.mrf.mxu0 }
 0x959   :  { %2935 = vpow2.f32 %v2535_v58 }
 0x95a   :  { %v821_v63 = vpop.f32.mrf.mxu1  ;;  %v1339_v1 = vpop.f32.mrf.mxu0 }
 0x95c   :  { %v2809_v2 = vpop.f32.mrf.mxu1  ;;  %v1340_v3 = vpop.f32.mrf.mxu0 }
 0x966   :  { %v2936_v4 = vpop.eup %2935  ;;  %v1376_v5 = vpop.f32.mrf.mxu1 }
 0x967   :  { %v1417_v6 = vpop.f32.mrf.mxu0  ;;  %v1632_v7 = vadd.f32 1.0, %v2936_v4  ;;  %v2536_v14 = vmul.f32 -1.442695, %v1376_v5 }
 0x968   :  { %v2537_v9 = vmul.f32 -1.442695, %v1417_v6  ;;  %v1378_v10 = vpop.f32.mrf.mxu1 }
 0x969   :  { %v1419_v11 = vpop.f32.mrf.mxu0  ;;  %2937 = vrcp.f32 %v1632_v7 }
 0x96a   :  { %2939 = vpow2.f32 %v2536_v14  ;;  %v1380_v12 = vpop.f32.mrf.mxu1 }
 0x96b   :  { %v1421_v13 = vpop.f32.mrf.mxu0  ;;  %2941 = vpow2.f32 %v2537_v9 }
 0x96c   :  { %v1381_v15 = vpop.f32.mrf.mxu1 }
 0x96d   :  { %v1422_v16 = vpop.f32.mrf.mxu0 }
 0x976   :  { %v2938_v17 = vpop.eup %2937  ;;  %v1458_v18 = vpop.f32.mrf.mxu1 }
 0x977   :  { %v1499_v19 = vpop.f32.mrf.mxu0  ;;  %v2940_v20 = vpop.eup %2939  ;;  %v1635_v21 = vmul.f32 %v2938_v17, %v1335_v57  ;;  %v2538_v22 = vmul.f32 -1.442695, %v1458_v18 }
 0x978   :  { %v2942_v23 = vpop.eup %2941  ;;  %v1646_v25 = vadd.f32 1.0, %v2940_v20  ;;  %v2539_v26 = vmul.f32 -1.442695, %v1499_v19  ;;  %v1460_v28 = vpop.f32.mrf.mxu1 }
 0x979   :  { %v1501_v29 = vpop.f32.mrf.mxu0  ;;  %v3472_v30 = vmul.f32 %v1635_v21, %v1337_v61  ;;  %v1659_v31 = vadd.f32 1.0, %v2942_v23  ;;  %2943 = vpow2.f32 %v2538_v22 }
 0x97a   :  { %2945 = vrcp.f32 %v1646_v25  ;;  %v1462_v32 = vpop.f32.mrf.mxu1 }
 0x97b   :  { %v1503_v33 = vpop.f32.mrf.mxu0  ;;  %2947 = vrcp.f32 %v1659_v31 }
 0x97c   :  { %2949 = vpow2.f32 %v2539_v26  ;;  %v1463_v34 = vpop.f32.mrf.mxu1  ;;  %v845_v26 = vand.u32 2147483647, %v3468_v62 }
 0x97d   :  { %v1504_v0 = vpop.f32.mrf.mxu0 }
 0x986   :  { %v2944_v35 = vpop.eup %2943  ;;  %v1540_v36 = vpop.f32.mrf.mxu1 }
 0x987   :  { %v1581_v37 = vpop.f32.mrf.mxu0  ;;  %v2946_v38 = vpop.eup %2945  ;;  %v1672_v40 = vadd.f32 1.0, %v2944_v35  ;;  %v2540_v42 = vmul.f32 -1.442695, %v1540_v36 }
 0x988   :  { %v2541_v43 = vmul.f32 -1.442695, %v1581_v37  ;;  %v2948_v44 = vpop.eup %2947  ;;  %v1649_v45 = vmul.f32 %v2946_v38, %v1376_v5  ;;  %v1542_v46 = vpop.f32.mrf.mxu1 }
 0x989   :  { %v1583_v47 = vpop.f32.mrf.mxu0  ;;  %v2950_v48 = vpop.eup %2949  ;;  %v1662_v49 = vmul.f32 %v2948_v44, %v1417_v6  ;;  %2951 = vrcp.f32 %v1672_v40 }
 0x98a   :  { %v3474_v50 = vmul.f32 %v1649_v45, %v1378_v10  ;;  %v1685_v39 = vadd.f32 1.0, %v2950_v48  ;;  %2953 = vpow2.f32 %v2540_v42  ;;  %v1544_v41 = vpop.f32.mrf.mxu1 }
 0x98b   :  { %v1585_v51 = vpop.f32.mrf.mxu0  ;;  %v3476_v52 = vmul.f32 %v1662_v49, %v1419_v11  ;;  %2955 = vpow2.f32 %v2541_v43 }
 0x98c   :  { %2957 = vrcp.f32 %v1685_v39  ;;  %v1545_v53 = vpop.f32.mrf.mxu1 }
 0x98d   :  { %v1586_v54 = vpop.f32.mrf.mxu0 }
 0x996   :  { %v2952_v55 = vpop.eup %2951  ;;  %v1622_v56 = vpop.f32.mrf.mxu1 }
 0x997   :  { %v2954_v57 = vpop.eup %2953  ;;  %v1675_v58 = vmul.f32 %v2952_v55, %v1458_v18  ;;  %v2542_v59 = vmul.f32 -1.442695, %v1622_v56 }
 0x998   :  { %v2956_v60 = vpop.eup %2955  ;;  %v1698_v61 = vadd.f32 1.0, %v2954_v57  ;;  %v1624_v63 = vpop.f32.mrf.mxu1 }
 0x999   :  { %v2958_v1 = vpop.eup %2957  ;;  %v3478_v2 = vmul.f32 %v1675_v58, %v1460_v28  ;;  %v1711_v3 = vadd.f32 1.0, %v2956_v60  ;;  %2959 = vpow2.f32 %v2542_v59 }
 0x99a   :  { %v1688_v4 = vmul.f32 %v2958_v1, %v1499_v19  ;;  %2961 = vrcp.f32 %v1698_v61  ;;  %v1626_v5 = vpop.f32.mrf.mxu1 }
 0x99b   :  { %2963 = vrcp.f32 %v1711_v3 }
 0x99c   :  { %v3480_v6 = vmul.f32 %v1688_v4, %v1501_v29  ;;  %v1627_v7 = vpop.f32.mrf.mxu1 }
 0x9a6   :  { %v2960_v14 = vpop.eup %2959 }
 0x9a7   :  { %v2962_v9 = vpop.eup %2961  ;;  %v1724_v10 = vadd.f32 1.0, %v2960_v14 }
 0x9a8   :  { %v2964_v11 = vpop.eup %2963  ;;  %v1701_v12 = vmul.f32 %v2962_v9, %v1540_v36 }
 0x9a9   :  { %v1714_v13 = vmul.f32 %v2964_v11, %v1581_v37  ;;  %2965 = vrcp.f32 %v1724_v10 }
 0x9aa   :  { %v3482_v15 = vmul.f32 %v1701_v12, %v1542_v46 }
 0x9ab   :  { %v3484_v16 = vmul.f32 %v1714_v13, %v1583_v47 }
 0x9b6   :  { %v2966_v17 = vpop.eup %2965 }
 0x9b7   :  { %v1727_v18 = vmul.f32 %v2966_v17, %v1622_v56 }
 0x9b9   :  { %v3486_v19 = vmul.f32 %v1727_v18, %v1624_v63 }
 0x9e1   :  { %v826_v20 = vpop.xlane.xlu0 %825 }
 0x9e2   :  { %vm827_vm10 = vcmp.eq.f32.partialorder %v3468_v62, %v826_v20  ;;  %v846_v28 = vmax.f32 %v845_v26, %v826_v20  ;;  %v847_v31 = vsub.f32 %v826_v20, %v3468_v62 }
 0x9e3   :  { %v828_v21 = vsel %vm827_vm10, %v3126_v27, 8 }
 0x9e4   :  { %v829_v22 = vsel %vm389_vm6, %v828_v21, 2147483647  ;;  %2967 = vrcp.f32 %v846_v28 }
 0x9e5   :  { %v831_v23 = vshra.s32 %v829_v22, 16  ;;  %v830_v32 = vand.u32 65535, %v829_v22 }
 0x9e7   :  { %v833_v25 = vcvt.s32.f32 %v831_v23  ;;  %v832_v0 = vcvt.s32.f32 %v830_v32 }
 0x9e9   :  { %834 = vmin.xlane.f32.xlu1 %v833_v25 }
 0x9f1   :  { %v2968_v29 = vpop.eup %2967 }
 0x9f2   :  { %v849_v33 = vmul.f32 %v2968_v29, %v847_v31 }
 0x9f4   :  { %vm850_vm11 = vcmp.gt.f32.partialorder %v849_v33, 0.02  ;;  %v3013_v33 = vmov 1  }
 0x9f5   :  { %v851_v36 = vsel %vm850_vm11, -inf, %v3468_v62  ;;  %2830 = vset.pattern.permute.xlu0 %v3013_v33  ;;  %v2883_v33 = vld [vmem:[%s3743_s11 + $0x170] sm:$0xff]  }
 0x9f6   :  { %v852_v37 = vsel %vm389_vm6, %v851_v36, -inf }
 0xa72   :  { %v835_v34 = vpop.xlane.xlu1 %834 }
 0xa73   :  { %vm836_vm12 = vcmp.eq.f32.partialorder %v833_v25, %v835_v34  ;;  %v841_v38 = vcvt.f32.s32 %v835_v34  ;;  %v2851_v34 = vld [vmem:[%s3743_s11 + $0x78] sm:$0xff]  }
 0xa74   :  { %v837_v35 = vsel %vm836_vm12, %v832_v0, inf  ;;  %v2852_v0 = vld [vmem:[%s3743_s11 + $0x38] sm:$0xff]   ;;  %2638 = vmatprep.subr.bf16.mxu0 %v2851_v34 }
 0xa75   :  { %838 = vmin.xlane.f32.xlu0 %v837_v35  ;;  %v842_v42 = vshll.u32 %v841_v38, 16  ;;  %v2853_v35 = vld [vmem:[%s3743_s11 + $0x70] sm:$0xff]   ;;  %2639 = vmatpush3.bf16.msra.mxu0 %v2852_v0 }
 0xa76   :  { %v2854_v38 = vld [vmem:[%s3743_s11 + $0x30] sm:$0xff]   ;;  %2640 = vmatprep.subr.bf16.mxu0 %v2853_v35  ;;  %v2887_v35 = vld [vmem:[%s3743_s11 + $0x168] sm:$0xff]  }
 0xa79   :  { %853 = vmax.xlane.f32.xlu0 %v852_v37  ;;  %v2858_v37 = vld [vmem:[%s3743_s11 + $0xb8] sm:$0xff]   ;;  %2641 = vmatpush3.bf16.msra.mxu0 %v2854_v38 }
 0xa7a   :  { %v2890_v38 = vld [vmem:[%s3743_s11 + $0x1b8] sm:$0xff]  }
 0xafe   :  { %v839_v40 = vpop.xlane.xlu0 %838 }
 0xaff   :  { %v840_v43 = vcvt.f32.s32 %v839_v40  ;;  %v2861_v40 = vld [vmem:[%s3743_s11 + $0xf0] sm:$0xff]  }
 0xb01   :  { %v3495_v44 = vadd.s32 %v842_v42, %v840_v43  ;;  %v2855_v42 = vld [vmem:[%s3743_s11 + $0x68] sm:$0xff]   ;;  %v2862_v43 = vld [vmem:[%s3743_s11 + $0xb0] sm:$0xff]  }
 0xb02   :  { %v854_v47 = vpop.xlane.xlu0 %853  ;;  %2642 = vmatprep.subr.bf16.mxu0 %v2855_v42 }
 0xb03   :  { %vm844_vm13 = vcmp.eq.s32.totalorder %v3126_v27, %v3495_v44  ;;  %v855_v49 = vsub.f32 %v851_v36, %v854_v47  ;;  %v2857_v36 = vld [vmem:[%s3743_s11 + $0xf8] sm:$0xff]   ;;  %v2859_v47 = vld [vmem:[%s3743_s11 + $0x60] sm:$0xff]   ;;  %v2877_v44 = vld [vmem:[%s3743_s11 + $0xd0] sm:$0xff]  }
 0xb04   :  { %v867_v45 = vsel %vm844_vm13, -inf, %v3468_v62  ;;  %2660 = vmatprep.subr.bf16.mxu1 %v2857_v36 }
 0xb05   :  { %v868_v46 = vsel %vm389_vm6, %v867_v45, -inf  ;;  %v856_v54 = vmul.f32 1.442695, %v855_v49  ;;  %2661 = vmatpush3.bf16.msra.mxu1 %v2858_v37  ;;  %v2869_v49 = vld [vmem:[%s3743_s11 + $0xe0] sm:$0xff]  }
 0xb06   :  { %869 = vmax.xlane.f32.xlu1 %v868_v46  ;;  %2662 = vmatprep.subr.bf16.mxu1 %v2861_v40  ;;  %v2856_v46 = vld [vmem:[%s3743_s11 + $0x28] sm:$0xff]   ;;  %v2891_v40 = vld [vmem:[%s3743_s11 + $0x160] sm:$0xff]  }
 0xb07   :  { %2643 = vmatpush3.bf16.msra.mxu0 %v2856_v46 }
 0xb08   :  { %2644 = vmatprep.subr.bf16.mxu0 %v2859_v47  ;;  %v2894_v47 = vld [vmem:[%s3743_s11 + $0x1b0] sm:$0xff]  }
 0xb09   :  { %2663 = vmatpush3.bf16.msra.mxu1 %v2862_v43  ;;  %v2893_v43 = vld [vmem:[%s3743_s11 + $0x1f0] sm:$0xff]  }
 0xb8f   :  { %v870_v48 = vpop.xlane.xlu1 %869 }
 0xb90   :  { %vm871_vm14 = vcmp.eq.f32.partialorder %v867_v45, %v870_v48  ;;  %v889_v39 = vmax.f32 %v845_v26, %v870_v48  ;;  %v890_v56 = vsub.f32 %v870_v48, %v3468_v62  ;;  %v2866_v48 = vld [vmem:[%s3743_s11 + $0xa8] sm:$0xff]  }
 0xb91   :  { %v872_v41 = vsel %vm871_vm14, %v3126_v27, 8 }
 0xb92   :  { %2969 = vrcp.f32 %v889_v39  ;;  %v873_v51 = vsel %vm389_vm6, %v872_v41, 2147483647  ;;  %v2860_v39 = vld [vmem:[%s3743_s11 + $0x20] sm:$0xff]   ;;  %v2863_v41 = vld [vmem:[%s3743_s11 + $0x58] sm:$0xff]  }
 0xb93   :  { %v875_v53 = vshra.s32 %v873_v51, 16  ;;  %2971 = vpow2.f32 %v856_v54  ;;  %v874_v1 = vand.u32 65535, %v873_v51  ;;  %v2870_v51 = vld [vmem:[%s3743_s11 + $0xa0] sm:$0xff]   ;;  %2645 = vmatpush3.bf16.msra.mxu0 %v2860_v39  ;;  %v2864_v54 = vld [vmem:[%s3743_s11 + $0x18] sm:$0xff]  }
 0xb94   :  { %2646 = vmatprep.subr.bf16.mxu0 %v2863_v41 }
 0xb95   :  { %v877_v55 = vcvt.s32.f32 %v875_v53  ;;  %v876_v4 = vcvt.s32.f32 %v874_v1  ;;  %v2873_v53 = vld [vmem:[%s3743_s11 + $0xd8] sm:$0xff]  }
 0xb97   :  { %878 = vmin.xlane.f32.xlu0 %v877_v55  ;;  %2647 = vmatpush3.bf16.msra.mxu0 %v2864_v54  ;;  %v2901_v54 = vld [vmem:[%s3743_s11 + $0x1e0] sm:$0xff]  }
 0xb9f   :  { %v2970_v57 = vpop.eup %2969 }
 0xba0   :  { %v892_v58 = vmul.f32 %v2970_v57, %v890_v56  ;;  %v2972_v61 = vpop.eup %2971  ;;  %v2874_v56 = vld [vmem:[%s3743_s11 + $0x98] sm:$0xff]   ;;  %v2868_v57 = vld [vmem:[%s3743_s11 + $0x10] sm:$0xff]  }
 0xba1   :  { %v858_v63 = vsel %vm389_vm6, %v2972_v61, 0.0 }
 0xba2   :  { %vm893_vm15 = vcmp.gt.f32.partialorder %v892_v58, 0.02  ;;  %v2871_v58 = vld [vmem:[%s3743_s11 + $0x48] sm:$0xff]  }
 0xba3   :  { %v894_v59 = vsel %vm893_vm15, -inf, %v867_v45  ;;  %v2865_v45 = vld [vmem:[%s3743_s11 + $0xe8] sm:$0xff]  }
 0xba4   :  { %v895_v60 = vsel %vm389_vm6, %v894_v59, -inf  ;;  %2664 = vmatprep.subr.bf16.mxu1 %v2865_v45  ;;  %v2892_v45 = vld [vmem:[%s3743_s11 + $0x120] sm:$0xff]  }
 0xba5   :  { %896 = vmax.xlane.f32.xlu1 %v895_v60  ;;  %2665 = vmatpush3.bf16.msra.mxu1 %v2866_v48  ;;  %v2895_v48 = vld [vmem:[%s3743_s11 + $0x158] sm:$0xff]  }
 0xba6   :  { %2666 = vmatprep.subr.bf16.mxu1 %v2869_v49  ;;  %v2897_v49 = vld [vmem:[%s3743_s11 + $0x1e8] sm:$0xff]  }
 0xba9   :  { %859 = vadd.xlane.f32.xlu1 %v858_v63  ;;  %2667 = vmatpush3.bf16.msra.mxu1 %v2870_v51  ;;  %v2898_v51 = vld [vmem:[%s3743_s11 + $0x1a8] sm:$0xff]  }
 0xbaa   :  { %2668 = vmatprep.subr.bf16.mxu1 %v2873_v53  ;;  %v2899_v53 = vld [vmem:[%s3743_s11 + $0x150] sm:$0xff]  }
 0xbad   :  { %2669 = vmatpush3.bf16.msra.mxu1 %v2874_v56  ;;  %v2902_v56 = vld [vmem:[%s3743_s11 + $0x1a0] sm:$0xff]  }
 0xbae   :  { %2670 = vmatprep.subr.bf16.mxu1 %v2877_v44 }
 0xc20   :  { %v879_v3 = vpop.xlane.xlu0 %878 }
 0xc21   :  { %vm880_vm1 = vcmp.eq.f32.partialorder %v877_v55, %v879_v3  ;;  %v885_v22 = vcvt.f32.s32 %v879_v3  ;;  %v2867_v55 = vld [vmem:[%s3743_s11 + $0x50] sm:$0xff]  }
 0xc22   :  { %v881_v5 = vsel %vm880_vm1, %v876_v4, inf  ;;  %2648 = vmatprep.subr.bf16.mxu0 %v2867_v55  ;;  %v2900_v55 = vld [vmem:[%s3743_s11 + $0x110] sm:$0xff]  }
 0xc23   :  { %882 = vmin.xlane.f32.xlu1 %v881_v5  ;;  %v886_v25 = vshll.u32 %v885_v22, 16  ;;  %2649 = vmatpush3.bf16.msra.mxu0 %v2868_v57  ;;  %v3019_v22 = vmov 6   ;;  %v2903_v57 = vld [vmem:[%s3743_s11 + $0x148] sm:$0xff]  }
 0xc24   :  { %2650 = vmatprep.subr.bf16.mxu0 %v2871_v58 }
 0xc2e   :  { %v897_v7 = vpop.xlane.xlu1 %896 }
 0xc2f   :  { %v898_v14 = vsub.f32 %v894_v59, %v897_v7  ;;  %v2872_v59 = vld [vmem:[%s3743_s11 + $0x8] sm:$0xff]   ;;  %v2875_v7 = vld [vmem:[%s3743_s11 + $0x40] sm:$0xff]  }
 0xc30   :  { %2651 = vmatpush3.bf16.msra.mxu0 %v2872_v59  ;;  %v2905_v59 = vld [vmem:[%s3743_s11 + $0x1d8] sm:$0xff]  }
 0xc31   :  { %v899_v62 = vmul.f32 1.442695, %v898_v14  ;;  %v2876_v14 = vld [vmem:[%s3743_s11] sm:$0xff]   ;;  %2652 = vmatprep.subr.bf16.mxu0 %v2875_v7  ;;  %v2910_v7 = vld [vmem:[%s3743_s11 + $0x190] sm:$0xff]  }
 0xc32   :  { %v860_v9 = vpop.xlane.xlu1 %859 }
 0xc33   :  { %2973 = vpow2.f32 %v899_v62  ;;  %v2880_v62 = vld [vmem:[%s3743_s11 + $0xc8] sm:$0xff]  }
 0xc34   :  { %2975 = vrcp.f32 %v860_v9  ;;  %2653 = vmatpush3.bf16.msra.mxu0 %v2876_v14  ;;  %v2882_v9 = vld [vmem:[%s3743_s11 + $0x88] sm:$0xff]  }
 0xc35   :  { %v2911_v14 = vld [vmem:[%s3743_s11 + $0x1c8] sm:$0xff]  }
 0xc40   :  { %v2974_v10 = vpop.eup %2973 }
 0xc41   :  { %v2976_v11 = vpop.eup %2975  ;;  %v901_v12 = vsel %vm389_vm6, %v2974_v10, 0.0 }
 0xc42   :  { %902 = vadd.xlane.f32.xlu0 %v901_v12  ;;  %v862_v13 = vmul.f32 %v2976_v11, %v2972_v61  ;;  %v2461_v61 = vsel %vm844_vm13, 1.0, %v3001_v8  ;;  %v2884_v11 = vld [vmem:[%s3743_s11 + $0xc0] sm:$0xff]   ;;  %v3015_v12 = vmov 7  }
 0xc44   :  { %v863_v17 = vsel %vm844_vm13, %v862_v13, 0.0  ;;  %v2886_v13 = vld [vmem:[%s3743_s11 + $0x80] sm:$0xff]  }
 0xc45   :  { %v864_v18 = vsel %vm389_vm6, %v863_v17, 0.0  ;;  %v3016_v17 = vmov 2  }
 0xc46   :  { %865 = vadd.xlane.f32.xlu0 %v864_v18  ;;  %v2889_v18 = vld [vmem:[%s3743_s11 + $0x1f8] sm:$0xff]  }
 0xcac   :  { %v883_v21 = vpop.xlane.xlu1 %882 }
 0xcad   :  { %v884_v23 = vcvt.f32.s32 %v883_v21  ;;  %v3018_v21 = vmov 4  }
 0xcaf   :  { %v887_v26 = vadd.s32 %v886_v25, %v884_v23 }
 0xcb1   :  { %vm888_vm2 = vcmp.eq.s32.totalorder %v3126_v27, %v887_v26  ;;  %v2879_v27 = vld [vmem:[%s3743_s11 + $0x178] sm:$0xff]  }
 0xcb2   :  { %v2462_v63 = vsel %vm888_vm2, 1.0, %v3001_v8  ;;  %v2878_v8 = vld [vmem:[%s3743_s11 + $0x90] sm:$0xff]   ;;  %2682 = vmatprep.subr.bf16.mxu0 %v2879_v27 }
 0xcb3   :  { %2671 = vmatpush3.bf16.msra.mxu1 %v2878_v8  ;;  %v2912_v8 = vld [vmem:[%s3743_s11 + $0x188] sm:$0xff]  }
 0xcb4   :  { %2672 = vmatprep.subr.bf16.mxu1 %v2880_v62  ;;  %v2914_v62 = vld [vmem:[%s3743_s11 + $0x180] sm:$0xff]  }
 0xcb7   :  { %2673 = vmatpush3.bf16.msra.mxu1 %v2882_v9 }
 0xcb8   :  { %2674 = vmatprep.subr.bf16.mxu1 %v2884_v11 }
 0xcbb   :  { %2675 = vmatpush3.bf16.msra.mxu1 %v2886_v13 }
 0xcbc   :  { %2704 = vmatprep.subr.bf16.mxu1 %v2889_v18 }
 0xccb   :  { %v903_v20 = vpop.xlane.xlu0 %902 }
 0xccc   :  { %2977 = vrcp.f32 %v903_v20  ;;  %v3017_v20 = vmov 5  }
 0xccf   :  { %v866_v60 = vpop.xlane.xlu0 %865 }
 0xcd0   :  { %v912_v3 = vmul.f32 %v2461_v61, %v866_v60  ;;  %v2904_v61 = vld [vmem:[%s3743_s11 + $0x108] sm:$0xff]  }
 0xcd9   :  { %v2978_v28 = vpop.eup %2977 }
 0xcda   :  { %v905_v29 = vmul.f32 %v2978_v28, %v2974_v10  ;;  %v3014_v10 = vmov 3  }
 0xcdc   :  { %v906_v31 = vsel %vm888_vm2, %v905_v29, 0.0 }
 0xcdd   :  { %v907_v32 = vsel %vm389_vm6, %v906_v31, 0.0 }
 0xcde   :  { %908 = vadd.xlane.f32.xlu1 %v907_v32  ;;  %v2881_v32 = vld [vmem:[%s3743_s11 + $0x138] sm:$0xff]  }
 0xd67   :  { %v909_v1 = vpop.xlane.xlu1 %908 }
 0xd68   :  { %v915_v4 = vmul.f32 %v2462_v63, %v909_v1  ;;  %v2906_v1 = vld [vmem:[%s3743_s11 + $0x198] sm:$0xff]  }
 0xd6a   :  { %v916_v5 = vadd.f32 %v915_v4, %v912_v3  ;;  %v2907_v3 = vld [vmem:[%s3743_s11 + $0x140] sm:$0xff]  }
 0xd6b   :  { %v2908_v4 = vld [vmem:[%s3743_s11 + $0x100] sm:$0xff]  }
 0xd6c   :  { %1639 = vperm.xlu1 %2831, %v916_v5   ;;  %1652 = vperm.xlu0 %2830, %v916_v5  }
 0xd70   :  { %2832 = vset.pattern.permute.xlu1 %v3014_v10  ;;  %2415 = vrot.lane.b32.xlu0 %v3220_v24, %s3006_s20 }
 0xd71   :  { %1678 = vperm.xlu1 %2832, %v916_v5   ;;  %2838 = vset.pattern.permute.xlu0 %v3015_v12 }
 0xd75   :  { %2833 = vset.pattern.permute.xlu1 %v3016_v17 }
 0xd76   :  { %1665 = vperm.xlu1 %2833, %v916_v5  }
 0xd7a   :  { %2834 = vset.pattern.permute.xlu1 %v3017_v20 }
 0xd7b   :  { %1704 = vperm.xlu1 %2834, %v916_v5  }
 0xd7f   :  { %2835 = vset.pattern.permute.xlu1 %v3018_v21 }
 0xd80   :  { %1691 = vperm.xlu1 %2835, %v916_v5  }
 0xd84   :  { %2836 = vset.pattern.permute.xlu1 %v3015_v12 }
 0xd85   :  { %1730 = vperm.xlu1 %2836, %v916_v5  }
 0xd89   :  { %2837 = vset.pattern.permute.xlu1 %v3019_v22 }
 0xd8a   :  { %1717 = vperm.xlu1 %2837, %v916_v5  }
 0xde7   :  { %v1640_v23 = vpop.permute.xlu1 %1639  ;;  %v1653_v25 = vpop.permute.xlu0 %1652 }
 0xde8   :  { %v1642_v26 = vmul.f32 %v1640_v23, %v3472_v30  ;;  %v1655_v28 = vmul.f32 %v1653_v25, %v3474_v50  ;;  %v2885_v30 = vld [vmem:[%s3743_s11 + $0x130] sm:$0xff]  }
 0xdea   :  { %v1734_v29 = vpack.c.bf16 %v1642_v26, %v1642_v26  ;;  %v1735_v31 = vpack.c.bf16 %v1655_v28, %v1655_v28 }
 0xdec   :  { %v1679_v34 = vpop.permute.xlu1 %1678  ;;  %2286 = vmatprep.mubr.bf16.mxu0 %v1735_v31 }
 0xded   :  { %v1681_v0 = vmul.f32 %v1679_v34, %v3478_v2  ;;  %2287 = vmatmul.mubr.bf16.vlgmr.msra.gmra.mxu0 %v1734_v29  ;;  %v2888_v2 = vld [vmem:[%s3743_s11 + $0x128] sm:$0xff]  }
 0xdee   :  { %2683 = vmatpush3.bf16.msra.mxu0 %v2881_v32 }
 0xdef   :  { %v1737_v50 = vpack.c.bf16 %v1681_v0, %v1681_v0  ;;  %2684 = vmatprep.subr.bf16.mxu0 %v2883_v33 }
 0xdf1   :  { %v1666_v36 = vpop.permute.xlu1 %1665  ;;  %2326 = vmatprep.mubr.bf16.mxu1 %v1737_v50 }
 0xdf2   :  { %v1668_v37 = vmul.f32 %v1666_v36, %v3476_v52  ;;  %2685 = vmatpush3.bf16.msra.mxu0 %v2885_v30 }
 0xdf3   :  { %2686 = vmatprep.subr.bf16.mxu0 %v2887_v35 }
 0xdf4   :  { %v1736_v42 = vpack.c.bf16 %v1668_v37, %v1668_v37  ;;  %v2416_v37 = vpop.permute.xlu0 %2415 }
 0xdf6   :  { %2687 = vmatpush3.bf16.msra.mxu0 %v2888_v2  ;;  %v1705_v52 = vpop.permute.xlu1 %1704  ;;  %2327 = vmatmul.mubr.bf16.vlgmr.msra.gmra.mxu1 %v1736_v42 }
 0xdf7   :  { %v1707_v46 = vmul.f32 %v1705_v52, %v3482_v15  ;;  %2705 = vmatpush3.bf16.msra.mxu1 %v2890_v38  ;;  %2688 = vmatprep.subr.bf16.mxu0 %v2891_v40  ;;  %v2896_v15 = vld [vmem:[%s3743_s11 + $0x118] sm:$0xff]  }
 0xdf8   :  { %2706 = vmatprep.subr.bf16.mxu1 %v2893_v43 }
 0xdf9   :  { %v1739_v39 = vpack.c.bf16 %v1707_v46, %v1707_v46 }
 0xdfa   :  { %2689 = vmatpush3.bf16.msra.mxu0 %v2892_v45 }
 0xdfb   :  { %2707 = vmatpush3.bf16.msra.mxu1 %v2894_v47  ;;  %v1692_v41 = vpop.permute.xlu1 %1691  ;;  %2366 = vmatprep.mubr.bf16.mxu0 %v1739_v39 }
 0xdfc   :  { %2690 = vmatprep.subr.bf16.mxu0 %v2895_v48  ;;  %2708 = vmatprep.subr.bf16.mxu1 %v2897_v49  ;;  %v1694_v5 = vmul.f32 %v1692_v41, %v3480_v6  ;;  %v2913_v6 = vld [vmem:[%s3743_s11 + $0x1c0] sm:$0xff]  }
 0xdfe   :  { %2691 = vmatpush3.bf16.msra.mxu0 %v2896_v15  ;;  %v1738_v44 = vpack.c.bf16 %v1694_v5, %v1694_v5 }
 0xdff   :  { %2709 = vmatpush3.bf16.msra.mxu1 %v2898_v51  ;;  %2692 = vmatprep.subr.bf16.mxu0 %v2899_v53 }
 0xe00   :  { %v1731_v58 = vpop.permute.xlu1 %1730  ;;  %2710 = vmatprep.subr.bf16.mxu1 %v2901_v54 }
 0xe01   :  { %v1733_v60 = vmul.f32 %v1731_v58, %v3486_v19  ;;  %v2909_v19 = vld [vmem:[%s3743_s11 + $0x1d0] sm:$0xff]   ;;  %s3020_s11 = smov [#allocation2]  }
 0xe02   :  { %2693 = vmatpush3.bf16.msra.mxu0 %v2900_v55  ;;  %s2426_s6 = sshll.u32 %s3020_s11, 4  ;;  %s2427_s6 = int_to_ptr.vmem [resolvable:$true] %s2426_s6 }
 0xe03   :  { %v1741_v63 = vpack.c.bf16 %v1733_v60, %v1733_v60  ;;  %2711 = vmatpush3.bf16.msra.mxu1 %v2902_v56  ;;  %2694 = vmatprep.subr.bf16.mxu0 %v2903_v57  ;;  %s2979_s25 = scalar_lea.vmem %s2427_s6, 128  ;;  %p2984_p1 = scmp.lt.s32.totalorder %s2427_s6, %s2427_s6 }
 0xe04   :  { %2712 = vmatprep.subr.bf16.mxu1 %v2905_v59  ;;  %p2980_p0 = scmp.ne.s32.totalorder %s2427_s6, %s2979_s25  ;;  %p2985_p2 = scmp.lt.s32.totalorder %s2979_s25, %s2979_s25 }
 0xe05   :  { %2406 = vmatprep.mubr.bf16.mxu1 %v1741_v63  ;;  %v1718_v27 = vpop.permute.xlu1 %1717 }
 0xe06   :  { %2695 = vmatpush3.bf16.msra.mxu0 %v2904_v61  ;;  %v1720_v9 = vmul.f32 %v1718_v27, %v3484_v16  ;;  %p2986_p3 = por %p2985_p2, %p2984_p1 }
 0xe07   :  { %2713 = vmatpush3.bf16.msra.mxu1 %v2906_v1  ;;  %2696 = vmatprep.subr.bf16.mxu0 %v2907_v3 }
 0xe08   :  { %2714 = vmatprep.subr.bf16.mxu1 %v2909_v19  ;;  %v1740_v10 = vpack.c.bf16 %v1720_v9, %v1720_v9  ;;  %p2987_p4 = pnand %p2986_p3, %p2980_p0 }
 0xe0a   :  { %2697 = vmatpush3.bf16.msra.mxu0 %v2908_v4 }
 0xe0b   :  { %2715 = vmatpush3.bf16.msra.mxu1 %v2910_v7 }
 0xe0c   :  { %2716 = vmatprep.subr.bf16.mxu1 %v2911_v14 }
 0xe0d   :  { %2367 = vmatmul.mubr.bf16.vlgmr.msra.gmra.mxu0 %v1738_v44 }
 0xe0f   :  { %2717 = vmatpush3.bf16.msra.mxu1 %v2912_v8 }
 0xe10   :  { %2718 = vmatprep.subr.bf16.mxu1 %v2913_v6 }
 0xe13   :  { %2719 = vmatpush3.bf16.msra.mxu1 %v2914_v62 }
 0xe16   :  { %2407 = vmatmul.mubr.bf16.vlgmr.msra.gmra.mxu1 %v1740_v10 }
 0xead   :  { %v2654_v11 = vpop.f32.mrf.mxu0 }
 0xeaf   :  { %v2655_v12 = vpop.f32.mrf.mxu0 }
 0xeb0   :  { %v2656_v26 = vadd.f32 %v2655_v12, %v2654_v11 }
 0xeb1   :  { %v2657_v13 = vpop.f32.mrf.mxu0 }
 0xeb2   :  { %v2289_v16 = vadd.f32 %v2656_v26, %v3220_v24 }
 0xeb3   :  { %v2658_v17 = vpop.f32.mrf.mxu0 }
 0xeb6   :  { %v2676_v18 = vpop.f32.mrf.mxu1 }
 0xeb8   :  { %v2677_v20 = vpop.f32.mrf.mxu1 }
 0xeb9   :  { %v2678_v29 = vadd.f32 %v2677_v20, %v2676_v18 }
 0xeba   :  { %v2679_v21 = vpop.f32.mrf.mxu1 }
 0xebb   :  { %v2329_v34 = vadd.f32 %v2678_v29, %v2289_v16 }
 0xebc   :  { %v2680_v22 = vpop.f32.mrf.mxu1 }
 0xecd   :  { %v2698_v23 = vpop.f32.mrf.mxu0 }
 0xecf   :  { %v2699_v25 = vpop.f32.mrf.mxu0 }
 0xed0   :  { %v2700_v32 = vadd.f32 %v2699_v25, %v2698_v23 }
 0xed1   :  { %v2701_v28 = vpop.f32.mrf.mxu0 }
 0xed2   :  { %v2369_v30 = vadd.f32 %v2700_v32, %v2329_v34 }
 0xed3   :  { %v2702_v31 = vpop.f32.mrf.mxu0 }
 0xed6   :  { %v2720_v33 = vpop.f32.mrf.mxu1 }
 0xed8   :  { %v2721_v0 = vpop.f32.mrf.mxu1 }
 0xed9   :  { %v2722_v50 = vadd.f32 %v2721_v0, %v2720_v33 }
 0xeda   :  { %v2723_v35 = vpop.f32.mrf.mxu1 }
 0xedb   :  { %v2409_v36 = vadd.f32 %v2722_v50, %v2369_v30 }
 0xedc   :  { %v2724_v2 = vpop.f32.mrf.mxu1 }
 0xedd   :  { %v2418_v38 = vsel %vm46_vm0, %v2409_v36, %v2416_v37 }
 0xede   :  { %2419 = vst [vmem:[#allocation2] sm:$0xff] %v2418_v38 }
 0xedf   :  { %2990 = shalt.err (!%p2987_p4)
}
 0xee0   :  { %2429 = dma.vmem_to_hbm [thread:$0]  %s2427_s6, 128, %s3744_s12, [#allocation3]  }
 0xee1   :  { %2999 = dma.done.wait [#allocation3], 128  }
 0xee2   :  { %3000 = vsyncadd [#allocation3], 4294967168 }
 0xee3   :  { %2433 = vsyncpa [#allocation3], 1 }

</bundles_post_ra>
